<compile_context>
chip_gen: v7x
topology: tpu7x:2x2x1
jax: 0.10.0
libtpu: 0.0.40
codegen_flags: <defaults>
</compile_context>

<pallas_src>
import jax
import jax.numpy as jnp
from jax.experimental import pallas as pl
from jax.experimental.pallas import tpu as pltpu

FEATURES = 16          # latent dim
IN_DIM = 3072          # 3 * 32 * 32 flattened image
H_DIM = 128


def _round_up(n, m):
    return ((n + m - 1) // m) * m


def vae_kernel(x_ref, eps_ref, w1_ref, b1_ref, w2_ref, b2_ref,
               w3_ref, b3_ref, w4_ref, b4_ref,
               reconst_ref, h2_ref):
    # enc1 + ReLU  (bf16 operands -> MXU, f32 accumulation)
    h1 = jnp.dot(x_ref[...], w1_ref[...], preferred_element_type=jnp.float32)
    h1 = jnp.maximum(h1 + b1_ref[...], 0.0)                              # (TB, 128) f32

    # enc2 -> (TB, 32); cols [:16] = mu, [16:] = log_var (matches view(-1, 2, 16))
    h2 = jnp.dot(h1, w2_ref[...], preferred_element_type=jnp.float32) + b2_ref[...]
    mu = h2[:, :FEATURES]
    log_var = h2[:, FEATURES:]

    # reparameterize: z = mu + eps * exp(0.5 * log_var)   (f32)
    z = mu + eps_ref[...] * jnp.exp(0.5 * log_var)                       # (TB, 16)

    # dec1 + ReLU
    h3 = jnp.dot(z, w3_ref[...], preferred_element_type=jnp.float32) + b3_ref[...]
    h3 = jnp.maximum(h3, 0.0)                                            # (TB, 128)

    # dec2 + sigmoid  (bf16 operands -> MXU, f32 accumulation)
    logits = jnp.dot(h3.astype(jnp.bfloat16), w4_ref[...],
                     preferred_element_type=jnp.float32) + b4_ref[...]
    reconst_ref[...] = jax.nn.sigmoid(logits)                            # (TB, 3072) f32
    h2_ref[...] = h2                                                     # lane-dense (TB, 32)


def vae_forward(x, params, eps, *, batch_tile=256):
    """x: (B, 3072) f32; eps: (B, 16) f32 (the randn_like draw). Returns (reconst, mu, log_var)."""
    B = x.shape[0]
    w1, b1, w2, b2, w3, b3, w4, b4 = params

    # Batch tile: multiple of 8 sublanes, capped at 256 rows (fits v7x VMEM budget).
    tb = min(batch_tile, _round_up(B, 8))
    b_pad = _round_up(B, tb)
    if b_pad != B:
        x = jnp.pad(x, ((0, b_pad - B), (0, 0)))
        eps = jnp.pad(eps, ((0, b_pad - B), (0, 0)))

    # The two big matmuls (enc1, dec2) carry >99% of FLOPs/bytes -> bf16 operands.
    x_bf = x.astype(jnp.bfloat16)
    w1_bf = w1.astype(jnp.bfloat16)
    w4_bf = w4.astype(jnp.bfloat16)

    grid = (b_pad // tb,)

    def row_spec(shape):            # tiled over batch
        return pl.BlockSpec(shape, lambda i: (i, 0))

    def const_spec(shape):          # resident in VMEM across all grid steps
        return pl.BlockSpec(shape, lambda i: (0, 0))

    flops = 2 * b_pad * (IN_DIM * H_DIM            # enc1
                         + H_DIM * 2 * FEATURES    # enc2
                         + FEATURES * H_DIM        # dec1
                         + H_DIM * IN_DIM)         # dec2
    transcendentals = b_pad * (FEATURES + IN_DIM)  # exp + sigmoid
    bytes_accessed = (x_bf.size * 2 + eps.size * 4
                      + w1_bf.size * 2 + w4_bf.size * 2
                      + (b1.size + w2.size + b2.size + w3.size + b3.size + b4.size) * 4
                      + b_pad * IN_DIM * 4          # reconst out
                      + b_pad * 2 * FEATURES * 4)   # h2 out

    reconst, h2 = pl.pallas_call(
        vae_kernel,
        grid=grid,
        in_specs=[
            row_spec((tb, IN_DIM)),                # x (bf16)
            row_spec((tb, FEATURES)),              # eps
            const_spec((IN_DIM, H_DIM)),           # w1 (bf16, resident)
            const_spec((1, H_DIM)),                # b1
            const_spec((H_DIM, 2 * FEATURES)),     # w2
            const_spec((1, 2 * FEATURES)),         # b2
            const_spec((FEATURES, H_DIM)),         # w3
            const_spec((1, H_DIM)),                # b3
            const_spec((H_DIM, IN_DIM)),           # w4 (bf16, resident)
            const_spec((1, IN_DIM)),               # b4
        ],
        out_specs=(
            row_spec((tb, IN_DIM)),                # reconst
            row_spec((tb, 2 * FEATURES)),          # h2 = [mu | log_var]
        ),
        out_shape=(
            jax.ShapeDtypeStruct((b_pad, IN_DIM), jnp.float32),
            jax.ShapeDtypeStruct((b_pad, 2 * FEATURES), jnp.float32),
        ),
        compiler_params=pltpu.CompilerParams(
            dimension_semantics=("parallel",)),
        cost_estimate=pl.CostEstimate(
            flops=flops,
            transcendentals=transcendentals,
            bytes_accessed=bytes_accessed),
    )(x_bf, eps, w1_bf, b1, w2, b2, w3, b3, w4_bf, b4)

    reconst = reconst[:B]
    mu = h2[:B, :FEATURES]
    log_var = h2[:B, FEATURES:]
    return reconst, mu, log_var


def init_linear(key, in_f, out_f):
    """Deterministic init mimicking PyTorch nn.Linear (uniform +- 1/sqrt(in))."""
    kw, kb = jax.random.split(key)
    bound = 1.0 / (in_f ** 0.5)
    # stored already transposed: (in_features, out_features)
    w = jax.random.uniform(kw, (in_f, out_f), jnp.float32, -bound, bound)
    b = jax.random.uniform(kb, (1, out_f), jnp.float32, -bound, bound)
    return w, b


if __name__ == "__main__":
    key = jax.random.PRNGKey(0)
    k_x, k_eps, k1, k2, k3, k4 = jax.random.split(key, 6)

    B = 2
    x = jax.random.normal(k_x, (B, IN_DIM), jnp.float32)
    # TODO(synk): torch.randn_like inside reparameterize() is hoisted to an explicit eps
    # input so the kernel stays deterministic; semantics are identical given the same draw.
    eps = jax.random.normal(k_eps, (B, FEATURES), jnp.float32)

    w1, b1 = init_linear(k1, IN_DIM, H_DIM)          # enc1
    w2, b2 = init_linear(k2, H_DIM, FEATURES * 2)    # enc2
    w3, b3 = init_linear(k3, FEATURES, H_DIM)        # dec1
    w4, b4 = init_linear(k4, H_DIM, IN_DIM)          # dec2
    params = (w1, b1, w2, b2, w3, b3, w4, b4)

    reconst, mu, log_var = vae_forward(x, params, eps)
    jax.block_until_ready((reconst, mu, log_var))

    # Pure-JAX reference with matching bf16 casts on the two big matmuls.
    x_bf = x.astype(jnp.bfloat16).astype(jnp.float32)
    w1_bf = w1.astype(jnp.bfloat16).astype(jnp.float32)
    w4_bf = w4.astype(jnp.bfloat16).astype(jnp.float32)
    h1 = jnp.maximum(x_bf @ w1_bf + b1, 0.0)
    h2 = h1 @ w2 + b2
    mu_ref, lv_ref = h2[:, :FEATURES], h2[:, FEATURES:]
    z = mu_ref + eps * jnp.exp(0.5 * lv_ref)
    h3 = jnp.maximum(z @ w3 + b3, 0.0)
    h3_bf = h3.astype(jnp.bfloat16).astype(jnp.float32)
    reconst_ref = jax.nn.sigmoid(h3_bf @ w4_bf + b4)

    assert jnp.allclose(reconst, reconst_ref, atol=2e-2)
    assert jnp.allclose(mu, mu_ref, atol=2e-2)
    assert jnp.allclose(log_var, lv_ref, atol=2e-2)

    print("KERNEL_OK")
</pallas_src>

<mosaic_0001>
module attributes {stable_mosaic.version = 11 : i64} {
  func.func @vae_kernel(%arg0: i32, %arg1: memref<8x3072xbf16, #tpu.memory_space<vmem>>, %arg2: memref<8x16xf32, #tpu.memory_space<vmem>>, %arg3: memref<3072x128xbf16, #tpu.memory_space<vmem>>, %arg4: memref<1x128xf32, #tpu.memory_space<vmem>>, %arg5: memref<128x32xf32, #tpu.memory_space<vmem>>, %arg6: memref<1x32xf32, #tpu.memory_space<vmem>>, %arg7: memref<16x128xf32, #tpu.memory_space<vmem>>, %arg8: memref<1x128xf32, #tpu.memory_space<vmem>>, %arg9: memref<128x3072xbf16, #tpu.memory_space<vmem>>, %arg10: memref<1x3072xf32, #tpu.memory_space<vmem>>, %arg11: memref<8x3072xf32, #tpu.memory_space<vmem>>, %arg12: memref<8x32xf32, #tpu.memory_space<vmem>>) attributes {dimension_semantics = [#tpu.dimension_semantics<parallel>], iteration_bounds = array<i64: 1>, scalar_prefetch = 0 : i64, scratch_operands = 0 : i64, tpu.core_type = #tpu.core_type<tc>, window_params = [{transform_indices = @transform_0, window_bounds = array<i64: 8, 3072>}, {transform_indices = @transform_1, window_bounds = array<i64: 8, 16>}, {pipeline_mode = #tpu.pipeline_mode<synchronous>, transform_indices = @transform_2, window_bounds = array<i64: 3072, 128>}, {pipeline_mode = #tpu.pipeline_mode<synchronous>, transform_indices = @transform_3, window_bounds = array<i64: 1, 128>}, {pipeline_mode = #tpu.pipeline_mode<synchronous>, transform_indices = @transform_4, window_bounds = array<i64: 128, 32>}, {pipeline_mode = #tpu.pipeline_mode<synchronous>, transform_indices = @transform_5, window_bounds = array<i64: 1, 32>}, {pipeline_mode = #tpu.pipeline_mode<synchronous>, transform_indices = @transform_6, window_bounds = array<i64: 16, 128>}, {pipeline_mode = #tpu.pipeline_mode<synchronous>, transform_indices = @transform_7, window_bounds = array<i64: 1, 128>}, {pipeline_mode = #tpu.pipeline_mode<synchronous>, transform_indices = @transform_8, window_bounds = array<i64: 128, 3072>}, {pipeline_mode = #tpu.pipeline_mode<synchronous>, transform_indices = @transform_9, window_bounds = array<i64: 1, 3072>}, {transform_indices = @transform_10, window_bounds = array<i64: 8, 3072>}, {transform_indices = @transform_11, window_bounds = array<i64: 8, 32>}]} {
    %c0 = arith.constant 0 : index
    %c0_0 = arith.constant 0 : index
    %0 = vector.load %arg1[%c0, %c0_0] : memref<8x3072xbf16, #tpu.memory_space<vmem>>, vector<8x3072xbf16>
    %c0_1 = arith.constant 0 : index
    %c0_2 = arith.constant 0 : index
    %1 = vector.load %arg3[%c0_1, %c0_2] : memref<3072x128xbf16, #tpu.memory_space<vmem>>, vector<3072x128xbf16>
    %cst = arith.constant dense<0.000000e+00> : vector<8x128xf32>
    %2 = tpu.matmul %0, %1, %cst {dimension_numbers = #tpu.dot_dimension_numbers<[1], [0], [0], [1], [0, 0, 1, 1], [], []>} : vector<8x3072xbf16>, vector<3072x128xbf16>, vector<8x128xf32> -> vector<8x128xf32>
    %c0_3 = arith.constant 0 : index
    %c0_4 = arith.constant 0 : index
    %3 = vector.load %arg4[%c0_3, %c0_4] : memref<1x128xf32, #tpu.memory_space<vmem>>, vector<1x128xf32>
    %4 = vector.broadcast %3 : vector<1x128xf32> to vector<8x128xf32>
    %5 = arith.addf %2, %4 : vector<8x128xf32>
    %cst_5 = arith.constant 0.000000e+00 : f32
    %6 = vector.broadcast %cst_5 : f32 to vector<8x128xf32>
    %7 = arith.maximumf %5, %6 : vector<8x128xf32>
    %c0_6 = arith.constant 0 : index
    %c0_7 = arith.constant 0 : index
    %8 = vector.load %arg5[%c0_6, %c0_7] : memref<128x32xf32, #tpu.memory_space<vmem>>, vector<128x32xf32>
    %cst_8 = arith.constant dense<0.000000e+00> : vector<8x32xf32>
    %9 = tpu.matmul %7, %8, %cst_8 {dimension_numbers = #tpu.dot_dimension_numbers<[1], [0], [0], [1], [0, 0, 1, 1], [], []>} : vector<8x128xf32>, vector<128x32xf32>, vector<8x32xf32> -> vector<8x32xf32>
    %c0_9 = arith.constant 0 : index
    %c0_10 = arith.constant 0 : index
    %10 = vector.load %arg6[%c0_9, %c0_10] : memref<1x32xf32, #tpu.memory_space<vmem>>, vector<1x32xf32>
    %11 = vector.broadcast %10 : vector<1x32xf32> to vector<8x32xf32>
    %12 = arith.addf %9, %11 : vector<8x32xf32>
    %13 = vector.extract_strided_slice %12 {offsets = [0, 0], sizes = [8, 16], strides = [1, 1]} : vector<8x32xf32> to vector<8x16xf32>
    %14 = vector.extract_strided_slice %12 {offsets = [0, 16], sizes = [8, 16], strides = [1, 1]} : vector<8x32xf32> to vector<8x16xf32>
    %c0_11 = arith.constant 0 : index
    %c0_12 = arith.constant 0 : index
    %15 = vector.load %arg2[%c0_11, %c0_12] : memref<8x16xf32, #tpu.memory_space<vmem>>, vector<8x16xf32>
    %cst_13 = arith.constant 5.000000e-01 : f32
    %16 = vector.broadcast %cst_13 : f32 to vector<8x16xf32>
    %17 = arith.mulf %16, %14 : vector<8x16xf32>
    %18 = math.exp %17 : vector<8x16xf32>
    %19 = arith.mulf %15, %18 : vector<8x16xf32>
    %20 = arith.addf %13, %19 : vector<8x16xf32>
    %c0_14 = arith.constant 0 : index
    %c0_15 = arith.constant 0 : index
    %21 = vector.load %arg7[%c0_14, %c0_15] : memref<16x128xf32, #tpu.memory_space<vmem>>, vector<16x128xf32>
    %cst_16 = arith.constant dense<0.000000e+00> : vector<8x128xf32>
    %22 = tpu.matmul %20, %21, %cst_16 {dimension_numbers = #tpu.dot_dimension_numbers<[1], [0], [0], [1], [0, 0, 1, 1], [], []>} : vector<8x16xf32>, vector<16x128xf32>, vector<8x128xf32> -> vector<8x128xf32>
    %c0_17 = arith.constant 0 : index
    %c0_18 = arith.constant 0 : index
    %23 = vector.load %arg8[%c0_17, %c0_18] : memref<1x128xf32, #tpu.memory_space<vmem>>, vector<1x128xf32>
    %24 = vector.broadcast %23 : vector<1x128xf32> to vector<8x128xf32>
    %25 = arith.addf %22, %24 : vector<8x128xf32>
    %cst_19 = arith.constant 0.000000e+00 : f32
    %26 = vector.broadcast %cst_19 : f32 to vector<8x128xf32>
    %27 = arith.maximumf %25, %26 : vector<8x128xf32>
    %28 = arith.truncf %27 : vector<8x128xf32> to vector<8x128xbf16>
    %c0_20 = arith.constant 0 : index
    %c0_21 = arith.constant 0 : index
    %29 = vector.load %arg9[%c0_20, %c0_21] : memref<128x3072xbf16, #tpu.memory_space<vmem>>, vector<128x3072xbf16>
    %cst_22 = arith.constant dense<0.000000e+00> : vector<8x3072xf32>
    %30 = tpu.matmul %28, %29, %cst_22 {dimension_numbers = #tpu.dot_dimension_numbers<[1], [0], [0], [1], [0, 0, 1, 1], [], []>} : vector<8x128xbf16>, vector<128x3072xbf16>, vector<8x3072xf32> -> vector<8x3072xf32>
    %c0_23 = arith.constant 0 : index
    %c0_24 = arith.constant 0 : index
    %31 = vector.load %arg10[%c0_23, %c0_24] : memref<1x3072xf32, #tpu.memory_space<vmem>>, vector<1x3072xf32>
    %32 = vector.broadcast %31 : vector<1x3072xf32> to vector<8x3072xf32>
    %33 = arith.addf %30, %32 : vector<8x3072xf32>
    %34 = arith.negf %33 : vector<8x3072xf32>
    %35 = math.exp %34 : vector<8x3072xf32>
    %cst_25 = arith.constant 1.000000e+00 : f32
    %36 = vector.broadcast %cst_25 : f32 to vector<8x3072xf32>
    %37 = arith.addf %36, %35 : vector<8x3072xf32>
    %38 = arith.divf %36, %37 : vector<8x3072xf32>
    %c0_26 = arith.constant 0 : index
    %c0_27 = arith.constant 0 : index
    %39 = vector.load %arg11[%c0_26, %c0_27] : memref<8x3072xf32, #tpu.memory_space<vmem>>, vector<8x3072xf32>
    tpu.vector_store %arg11[%c0_26, %c0_27], %38 {strides = array<i32>} : memref<8x3072xf32, #tpu.memory_space<vmem>>, vector<8x3072xf32>,
    %c0_28 = arith.constant 0 : index
    %c0_29 = arith.constant 0 : index
    %40 = vector.load %arg12[%c0_28, %c0_29] : memref<8x32xf32, #tpu.memory_space<vmem>>, vector<8x32xf32>
    tpu.vector_store %arg12[%c0_28, %c0_29], %12 {strides = array<i32>} : memref<8x32xf32, #tpu.memory_space<vmem>>, vector<8x32xf32>,
    return
  }
  func.func @transform_0(%arg0: i32) -> (i32, i32) {
    %c0_i32 = arith.constant 0 : i32
    %c0_i32_0 = arith.constant 0 : i32
    return %arg0, %c0_i32 : i32, i32
  }
  func.func @transform_1(%arg0: i32) -> (i32, i32) {
    %c0_i32 = arith.constant 0 : i32
    %c0_i32_0 = arith.constant 0 : i32
    return %arg0, %c0_i32 : i32, i32
  }
  func.func @transform_2(%arg0: i32) -> (i32, i32) {
    %c0_i32 = arith.constant 0 : i32
    %c0_i32_0 = arith.constant 0 : i32
    %c0_i32_1 = arith.constant 0 : i32
    return %c0_i32, %c0_i32_0 : i32, i32
  }
  func.func @transform_3(%arg0: i32) -> (i32, i32) {
    %c0_i32 = arith.constant 0 : i32
    %c0_i32_0 = arith.constant 0 : i32
    %c0_i32_1 = arith.constant 0 : i32
    return %c0_i32, %c0_i32_0 : i32, i32
  }
  func.func @transform_4(%arg0: i32) -> (i32, i32) {
    %c0_i32 = arith.constant 0 : i32
    %c0_i32_0 = arith.constant 0 : i32
    %c0_i32_1 = arith.constant 0 : i32
    return %c0_i32, %c0_i32_0 : i32, i32
  }
  func.func @transform_5(%arg0: i32) -> (i32, i32) {
    %c0_i32 = arith.constant 0 : i32
    %c0_i32_0 = arith.constant 0 : i32
    %c0_i32_1 = arith.constant 0 : i32
    return %c0_i32, %c0_i32_0 : i32, i32
  }
  func.func @transform_6(%arg0: i32) -> (i32, i32) {
    %c0_i32 = arith.constant 0 : i32
    %c0_i32_0 = arith.constant 0 : i32
    %c0_i32_1 = arith.constant 0 : i32
    return %c0_i32, %c0_i32_0 : i32, i32
  }
  func.func @transform_7(%arg0: i32) -> (i32, i32) {
    %c0_i32 = arith.constant 0 : i32
    %c0_i32_0 = arith.constant 0 : i32
    %c0_i32_1 = arith.constant 0 : i32
    return %c0_i32, %c0_i32_0 : i32, i32
  }
  func.func @transform_8(%arg0: i32) -> (i32, i32) {
    %c0_i32 = arith.constant 0 : i32
    %c0_i32_0 = arith.constant 0 : i32
    %c0_i32_1 = arith.constant 0 : i32
    return %c0_i32, %c0_i32_0 : i32, i32
  }
  func.func @transform_9(%arg0: i32) -> (i32, i32) {
    %c0_i32 = arith.constant 0 : i32
    %c0_i32_0 = arith.constant 0 : i32
    %c0_i32_1 = arith.constant 0 : i32
    return %c0_i32, %c0_i32_0 : i32, i32
  }
  func.func @transform_10(%arg0: i32) -> (i32, i32) {
    %c0_i32 = arith.constant 0 : i32
    %c0_i32_0 = arith.constant 0 : i32
    return %arg0, %c0_i32 : i32, i32
  }
  func.func @transform_11(%arg0: i32) -> (i32, i32) {
    %c0_i32 = arith.constant 0 : i32
    %c0_i32_0 = arith.constant 0 : i32
    return %arg0, %c0_i32 : i32, i32
  }
}

</mosaic_0001>

<bundles_post_ra>
// kernel: tpu_custom_call.1
= control target key start
LH: loop header
LB: loop body
LE: loop exit
PB: predicated region body
PF: predicated region fallthrough
CT: control target
= control target key end

     0   :  { %17 = vsyncpa [#allocation3], 0  ;;  %s5886_s0 = inlined_call_operand.vmem [shape: bf16[8,3072], index: 0, kind: input, shape index: {}]   ;;  %s5887_s1 = inlined_call_operand.vmem [shape: f32[8,16], index: 1, kind: input, shape index: {}]   ;;  %s5888_s2 = inlined_call_operand.hbm [shape: bf16[3072,128], index: 2, kind: input, shape index: {}]   ;;  %s5889_s3 = inlined_call_operand.vmem [shape: f32[1,128], index: 3, kind: input, shape index: {}]   ;;  %s5890_s4 = inlined_call_operand.vmem [shape: f32[128,32], index: 4, kind: input, shape index: {}]   ;;  %s5891_s5 = inlined_call_operand.vmem [shape: f32[1,32], index: 5, kind: input, shape index: {}]   ;;  %s5892_s6 = inlined_call_operand.vmem [shape: f32[16,128], index: 6, kind: input, shape index: {}]   ;;  %s5893_s7 = inlined_call_operand.vmem [shape: f32[1,128], index: 7, kind: input, shape index: {}]   ;;  %s5894_s8 = inlined_call_operand.hbm [shape: bf16[128,3072], index: 8, kind: input, shape index: {}]   ;;  %s5895_s9 = inlined_call_operand.vmem [shape: f32[1,3072], index: 9, kind: input, shape index: {}]   ;;  %s5896_s10 = inlined_call_operand.hbm [shape: f32[8,3072], index: 10, kind: output, shape index: {0}]   ;;  %s5897_s11 = inlined_call_operand.hbm [shape: f32[8,32], index: 11, kind: output, shape index: {1}]  }
   0x1   :  { %18 = vsyncpa [#allocation6], 0 }
   0x2   :  { %19 = vsyncpa [#allocation4], 0 }
   0x3   :  { %20 = vsyncpa [#allocation9], 0  ;;  %s5558_s17 = smov [#allocation2]   ;;  %s5462_s21 = scalar_lea.hbm %s5888_s2, 24576 }
   0x4   :  { %s30_s18 = sshll.u32 %s5558_s17, 4  ;;  %p5463_p0 = scmp.ne.s32.totalorder %s5888_s2, %s5462_s21  ;;  %s31_s18 = int_to_ptr.vmem [resolvable:$true] %s30_s18 }
   0x5   :  { %p5466_p1 = scmp.lt.u32.totalorder %s5462_s21, %s5888_s2 }
   0x7   :  { %p5468_p2 = pnand %p5466_p1, %p5463_p0 }
   0x9   :  { %5471 = shalt.err (!%p5468_p2)
}
   0xa   :  { %s5472_s26 = scalar_lea.vmem %s31_s18, 24576  ;;  %p5477_p4 = scmp.lt.s32.totalorder %s31_s18, %s31_s18 }
   0xb   :  { %p5473_p3 = scmp.ne.s32.totalorder %s31_s18, %s5472_s26  ;;  %p5478_p5 = scmp.lt.s32.totalorder %s5472_s26, %s5472_s26 }
   0xd   :  { %p5479_p6 = por %p5478_p5, %p5477_p4 }
   0xf   :  { %p5480_p7 = pnand %p5479_p6, %p5473_p3 }
  0x11   :  { %5483 = shalt.err (!%p5480_p7)
}
  0x12   :  { %s5559_s27 = smov 64   ;;  %s5560_s28 = smov 4  }
  0x13   :  { %36 = dma.hbm_to_vmem [thread:$0]  %s5888_s2, 24576, %s31_s18, [#allocation3], %s5559_s27, %s5559_s27, %s5560_s28  }
  0x14   :  { %s5561_s12 = smov [#allocation5]   ;;  %s5484_s16 = scalar_lea.hbm %s5894_s8, 24576 }
  0x15   :  { %s52_s13 = sshll.u32 %s5561_s12, 4  ;;  %p5485_p8 = scmp.ne.s32.totalorder %s5894_s8, %s5484_s16  ;;  %s53_s13 = int_to_ptr.vmem [resolvable:$true] %s52_s13 }
  0x16   :  { %p5488_p9 = scmp.lt.u32.totalorder %s5484_s16, %s5894_s8 }
  0x18   :  { %p5490_p10 = pnand %p5488_p9, %p5485_p8 }
  0x1a   :  { %5493 = shalt.err (!%p5490_p10)
}
  0x1b   :  { %s5494_s22 = scalar_lea.vmem %s53_s13, 24576  ;;  %p5499_p12 = scmp.lt.s32.totalorder %s53_s13, %s53_s13 }
  0x1c   :  { %p5495_p11 = scmp.ne.s32.totalorder %s53_s13, %s5494_s22  ;;  %p5500_p13 = scmp.lt.s32.totalorder %s5494_s22, %s5494_s22 }
  0x1e   :  { %p5501_p0 = por %p5500_p13, %p5499_p12 }
  0x20   :  { %p5502_p1 = pnand %p5501_p0, %p5495_p11 }
  0x22   :  { %5505 = shalt.err (!%p5502_p1)
}
  0x23   :  { %s5562_s2 = smov 1536   ;;  %s5563_s18 = smov 96  }
  0x24   :  { %58 = dma.hbm_to_vmem [thread:$0]  %s5894_s8, 24576, %s53_s13, [#allocation6], %s5562_s2, %s5562_s2, %s5563_s18  }
  0x25   :  { %5550 = dma.done.wait [#allocation3], 24576  }
  0x26   :  { %5551 = vsyncadd [#allocation3], 4294942720 }
  0x27   :  { %5552 = dma.done.wait [#allocation6], 24576  }
  0x28   :  { %5553 = vsyncadd [#allocation6], 4294942720  ;;  %v5148_v0 = vld [vmem:[#allocation2 + $0x40] sm:$0xff]   ;;  %v5152_v4 = vld [vmem:[#allocation2 + $0x48] sm:$0xff]   ;;  %vm5565_vm0 = vmmov 0   ;;  %vm4314_vm1 = vcmask 261120  }
  0x29   :  { %v5149_v1 = vld [vmem:[#allocation2 + $0xc0] sm:$0xff]   ;;  %4782 = vmatprep.subr.bf16.mxu0 %v5148_v0  ;;  %v5153_v5 = vld [vmem:[#allocation2 + $0xc8] sm:$0xff]   ;;  %v5156_v8 = vld [vmem:[#allocation2 + $0x50] sm:$0xff]   ;;  %vm2300_vm2 = vcmask 130048   ;;  %s5569_s25 = smov [#allocation8]  }
  0x2a   :  { %v5150_v2 = vld [vmem:[#allocation2] sm:$0xff]   ;;  %4804 = vmatprep.subr.bf16.mxu1 %v5149_v1  ;;  %v5154_v6 = vld [vmem:[#allocation2 + $0x8] sm:$0xff]   ;;  %v5157_v9 = vld [vmem:[#allocation2 + $0xd0] sm:$0xff]   ;;  %s4332_s26 = sshll.u32 %s5569_s25, 4  ;;  %s4333_s26 = int_to_ptr.vmem [resolvable:$true] %s4332_s26 }
  0x2b   :  { %v5151_v3 = vld [vmem:[#allocation2 + $0x80] sm:$0xff]   ;;  %4783 = vmatpush3.bf16.msra.mxu0 %v5150_v2  ;;  %v5155_v7 = vld [vmem:[#allocation2 + $0x88] sm:$0xff]   ;;  %v5158_v10 = vld [vmem:[#allocation2 + $0x10] sm:$0xff]   ;;  %s5506_s27 = scalar_lea.vmem %s4333_s26, 128  ;;  %p5511_p3 = scmp.lt.s32.totalorder %s4333_s26, %s4333_s26 }
  0x2c   :  { %4805 = vmatpush3.bf16.msra.mxu1 %v5151_v3  ;;  %4784 = vmatprep.subr.bf16.mxu0 %v5152_v4  ;;  %v5159_v11 = vld [vmem:[#allocation2 + $0x90] sm:$0xff]   ;;  %v5160_v12 = vld [vmem:[#allocation2 + $0x58] sm:$0xff]   ;;  %v5164_v16 = vld [vmem:[#allocation2 + $0x60] sm:$0xff]   ;;  %p5507_p2 = scmp.ne.s32.totalorder %s4333_s26, %s5506_s27  ;;  %p5512_p4 = scmp.lt.s32.totalorder %s5506_s27, %s5506_s27 }
  0x2d   :  { %4806 = vmatprep.subr.bf16.mxu1 %v5153_v5  ;;  %v5161_v13 = vld [vmem:[#allocation2 + $0xd8] sm:$0xff]   ;;  %v5165_v17 = vld [vmem:[#allocation2 + $0xe0] sm:$0xff]   ;;  %v5168_v20 = vld [vmem:[#allocation2 + $0x68] sm:$0xff]  }
  0x2e   :  { %v5162_v14 = vld [vmem:[#allocation2 + $0x18] sm:$0xff]   ;;  %v5166_v18 = vld [vmem:[#allocation2 + $0x20] sm:$0xff]   ;;  %v5169_v21 = vld [vmem:[#allocation2 + $0xe8] sm:$0xff]   ;;  %p5513_p5 = por %p5512_p4, %p5511_p3 }
  0x2f   :  { %4785 = vmatpush3.bf16.msra.mxu0 %v5154_v6  ;;  %v5163_v15 = vld [vmem:[#allocation2 + $0x98] sm:$0xff]   ;;  %v5167_v19 = vld [vmem:[#allocation2 + $0xa0] sm:$0xff]   ;;  %v5170_v22 = vld [vmem:[#allocation2 + $0x28] sm:$0xff]  }
  0x30   :  { %4807 = vmatpush3.bf16.msra.mxu1 %v5155_v7  ;;  %4786 = vmatprep.subr.bf16.mxu0 %v5156_v8  ;;  %v5171_v23 = vld [vmem:[#allocation2 + $0xa8] sm:$0xff]   ;;  %v5172_v24 = vld [vmem:[#allocation2 + $0x70] sm:$0xff]   ;;  %v5176_v28 = vld [vmem:[#allocation2 + $0x78] sm:$0xff]   ;;  %p5514_p6 = pnand %p5513_p5, %p5507_p2 }
  0x31   :  { %4808 = vmatprep.subr.bf16.mxu1 %v5157_v9  ;;  %v5173_v25 = vld [vmem:[#allocation2 + $0xf0] sm:$0xff]   ;;  %v5177_v29 = vld [vmem:[#allocation2 + $0xf8] sm:$0xff]   ;;  %v68_v32 = vld [vmem:[%s5886_s0] sm:$0xff] }
  0x32   :  { %v5174_v26 = vld [vmem:[#allocation2 + $0x30] sm:$0xff]   ;;  %v5178_v30 = vld [vmem:[#allocation2 + $0x38] sm:$0xff]   ;;  %v69_v33 = vld [vmem:[%s5886_s0 + $0x8] sm:$0xff]  ;;  %v4347_v34 = vcombine.low %v68_v32, %v68_v32  ;;  %v4348_v35 = vcombine.high %v68_v32, %v68_v32 }
  0x33   :  { %4787 = vmatpush3.bf16.msra.mxu0 %v5158_v10  ;;  %v5175_v27 = vld [vmem:[#allocation2 + $0xb0] sm:$0xff]   ;;  %v5179_v31 = vld [vmem:[#allocation2 + $0xb8] sm:$0xff]   ;;  %v4349_v36 = vcombine.low %v69_v33, %v69_v33  ;;  %v4350_v37 = vcombine.high %v69_v33, %v69_v33  ;;  %v5184_v38 = vld [vmem:[#allocation2 + $0x140] sm:$0xff]  }
  0x34   :  { %4809 = vmatpush3.bf16.msra.mxu1 %v5159_v11  ;;  %4788 = vmatprep.subr.bf16.mxu0 %v5160_v12  ;;  %v5185_v39 = vld [vmem:[#allocation2 + $0x1c0] sm:$0xff]   ;;  %v5188_v42 = vld [vmem:[#allocation2 + $0x148] sm:$0xff]   ;;  %v5192_v46 = vld [vmem:[#allocation2 + $0x150] sm:$0xff]  }
  0x35   :  { %4810 = vmatprep.subr.bf16.mxu1 %v5161_v13  ;;  %1739 = vmatprep.mubr.bf16.mxu0 %v4348_v35  ;;  %v5186_v40 = vld [vmem:[#allocation2 + $0x100] sm:$0xff]   ;;  %v5189_v43 = vld [vmem:[#allocation2 + $0x1c8] sm:$0xff]   ;;  %v5193_v47 = vld [vmem:[#allocation2 + $0x1d0] sm:$0xff]  }
  0x36   :  { %1779 = vmatprep.mubr.bf16.mxu1 %v4350_v37  ;;  %v5187_v41 = vld [vmem:[#allocation2 + $0x180] sm:$0xff]   ;;  %v5190_v44 = vld [vmem:[#allocation2 + $0x108] sm:$0xff]   ;;  %v5194_v48 = vld [vmem:[#allocation2 + $0x110] sm:$0xff]  }
  0x37   :  { %4789 = vmatpush3.bf16.msra.mxu0 %v5162_v14  ;;  %v5191_v45 = vld [vmem:[#allocation2 + $0x188] sm:$0xff]   ;;  %v5195_v49 = vld [vmem:[#allocation2 + $0x190] sm:$0xff]   ;;  %v5196_v50 = vld [vmem:[#allocation2 + $0x158] sm:$0xff]  }
  0x38   :  { %4811 = vmatpush3.bf16.msra.mxu1 %v5163_v15  ;;  %4790 = vmatprep.subr.bf16.mxu0 %v5164_v16  ;;  %v5197_v51 = vld [vmem:[#allocation2 + $0x1d8] sm:$0xff]   ;;  %v5200_v54 = vld [vmem:[#allocation2 + $0x160] sm:$0xff]   ;;  %v5204_v58 = vld [vmem:[#allocation2 + $0x168] sm:$0xff]  }
  0x39   :  { %4812 = vmatprep.subr.bf16.mxu1 %v5165_v17  ;;  %v5198_v52 = vld [vmem:[#allocation2 + $0x118] sm:$0xff]   ;;  %v5201_v55 = vld [vmem:[#allocation2 + $0x1e0] sm:$0xff]   ;;  %v5205_v59 = vld [vmem:[#allocation2 + $0x1e8] sm:$0xff]  }
  0x3a   :  { %v5199_v53 = vld [vmem:[#allocation2 + $0x198] sm:$0xff]   ;;  %v5202_v56 = vld [vmem:[#allocation2 + $0x120] sm:$0xff]   ;;  %v5206_v60 = vld [vmem:[#allocation2 + $0x128] sm:$0xff]  }
  0x3b   :  { %4791 = vmatpush3.bf16.msra.mxu0 %v5166_v18  ;;  %v5203_v57 = vld [vmem:[#allocation2 + $0x1a0] sm:$0xff]   ;;  %v5207_v61 = vld [vmem:[#allocation2 + $0x1a8] sm:$0xff]   ;;  %v5208_v62 = vld [vmem:[#allocation2 + $0x170] sm:$0xff]  }
  0x3c   :  { %4813 = vmatpush3.bf16.msra.mxu1 %v5167_v19  ;;  %4792 = vmatprep.subr.bf16.mxu0 %v5168_v20  ;;  %v5209_v63 = vld [vmem:[#allocation2 + $0x1f0] sm:$0xff]   ;;  %v5212_v2 = vld [vmem:[#allocation2 + $0x178] sm:$0xff]   ;;  %v5220_v12 = vld [vmem:[#allocation2 + $0x240] sm:$0xff]  }
  0x3d   :  { %4814 = vmatprep.subr.bf16.mxu1 %v5169_v21  ;;  %v5210_v0 = vld [vmem:[#allocation2 + $0x130] sm:$0xff]   ;;  %v5213_v3 = vld [vmem:[#allocation2 + $0x1f8] sm:$0xff]   ;;  %v5221_v13 = vld [vmem:[#allocation2 + $0x2c0] sm:$0xff]  }
  0x3e   :  { %v5211_v1 = vld [vmem:[#allocation2 + $0x1b0] sm:$0xff]   ;;  %v5214_v4 = vld [vmem:[#allocation2 + $0x138] sm:$0xff]   ;;  %v5222_v14 = vld [vmem:[#allocation2 + $0x200] sm:$0xff]  }
  0x3f   :  { %4793 = vmatpush3.bf16.msra.mxu0 %v5170_v22  ;;  %v5215_v5 = vld [vmem:[#allocation2 + $0x1b8] sm:$0xff]   ;;  %v70_v6 = vld [vmem:[%s5886_s0 + $0x10] sm:$0xff]  ;;  %v5223_v15 = vld [vmem:[#allocation2 + $0x280] sm:$0xff]  }
  0x40   :  { %4815 = vmatpush3.bf16.msra.mxu1 %v5171_v23  ;;  %4794 = vmatprep.subr.bf16.mxu0 %v5172_v24  ;;  %v4351_v7 = vcombine.low %v70_v6, %v70_v6  ;;  %v4352_v8 = vcombine.high %v70_v6, %v70_v6  ;;  %v71_v9 = vld [vmem:[%s5886_s0 + $0x18] sm:$0xff]  ;;  %v5224_v16 = vld [vmem:[#allocation2 + $0x248] sm:$0xff]   ;;  %v5228_v20 = vld [vmem:[#allocation2 + $0x250] sm:$0xff]  }
  0x41   :  { %4816 = vmatprep.subr.bf16.mxu1 %v5173_v25  ;;  %v4353_v10 = vcombine.low %v71_v9, %v71_v9  ;;  %v4354_v11 = vcombine.high %v71_v9, %v71_v9  ;;  %v5225_v17 = vld [vmem:[#allocation2 + $0x2c8] sm:$0xff]   ;;  %v5229_v21 = vld [vmem:[#allocation2 + $0x2d0] sm:$0xff]   ;;  %v5232_v24 = vld [vmem:[#allocation2 + $0x258] sm:$0xff]  }
  0x42   :  { %v5226_v18 = vld [vmem:[#allocation2 + $0x208] sm:$0xff]   ;;  %v5230_v22 = vld [vmem:[#allocation2 + $0x210] sm:$0xff]   ;;  %v5233_v25 = vld [vmem:[#allocation2 + $0x2d8] sm:$0xff]  }
  0x43   :  { %4795 = vmatpush3.bf16.msra.mxu0 %v5174_v26  ;;  %v5227_v19 = vld [vmem:[#allocation2 + $0x288] sm:$0xff]   ;;  %v5231_v23 = vld [vmem:[#allocation2 + $0x290] sm:$0xff]   ;;  %v5234_v26 = vld [vmem:[#allocation2 + $0x218] sm:$0xff]  }
  0x44   :  { %4817 = vmatpush3.bf16.msra.mxu1 %v5175_v27  ;;  %4796 = vmatprep.subr.bf16.mxu0 %v5176_v28  ;;  %v5235_v27 = vld [vmem:[#allocation2 + $0x298] sm:$0xff]   ;;  %v5236_v28 = vld [vmem:[#allocation2 + $0x260] sm:$0xff]   ;;  %v5240_v32 = vld [vmem:[#allocation2 + $0x268] sm:$0xff]  }
  0x45   :  { %4818 = vmatprep.subr.bf16.mxu1 %v5177_v29  ;;  %v5237_v29 = vld [vmem:[#allocation2 + $0x2e0] sm:$0xff]   ;;  %v5241_v33 = vld [vmem:[#allocation2 + $0x2e8] sm:$0xff]   ;;  %v5245_v37 = vld [vmem:[#allocation2 + $0x2f0] sm:$0xff]  }
  0x46   :  { %v5243_v35 = vld [vmem:[#allocation2 + $0x2a8] sm:$0xff]  }
  0x47   :  { %4797 = vmatpush3.bf16.msra.mxu0 %v5178_v30  ;;  %v5238_v30 = vld [vmem:[#allocation2 + $0x220] sm:$0xff]   ;;  %v5276_v6 = vld [vmem:[#allocation2 + $0x368] sm:$0xff]  }
  0x48   :  { %4819 = vmatpush3.bf16.msra.mxu1 %v5179_v31  ;;  %4826 = vmatprep.subr.bf16.mxu0 %v5184_v38  ;;  %v5239_v31 = vld [vmem:[#allocation2 + $0x2a0] sm:$0xff]   ;;  %v5246_v38 = vld [vmem:[#allocation2 + $0x230] sm:$0xff]   ;;  %v5279_v9 = vld [vmem:[#allocation2 + $0x3a8] sm:$0xff]  }
  0x49   :  { %4848 = vmatprep.subr.bf16.mxu1 %v5185_v39  ;;  %v5247_v39 = vld [vmem:[#allocation2 + $0x2b0] sm:$0xff]  }
  0x4a   :  { %1740 = vmatmul.mubr.bf16.vlgmr.msra.gmra.mrb[0].mxu0 %v4347_v34  ;;  %v5242_v34 = vld [vmem:[#allocation2 + $0x228] sm:$0xff]  }
  0x4b   :  { %1780 = vmatmul.mubr.bf16.vlgmr.msra.gmra.mrb[0].mxu1 %v4349_v36  ;;  %4827 = vmatpush3.bf16.msra.mxu0 %v5186_v40  ;;  %v5244_v36 = vld [vmem:[#allocation2 + $0x270] sm:$0xff]   ;;  %v5248_v40 = vld [vmem:[#allocation2 + $0x278] sm:$0xff]  }
  0x4c   :  { %4849 = vmatpush3.bf16.msra.mxu1 %v5187_v41  ;;  %4828 = vmatprep.subr.bf16.mxu0 %v5188_v42  ;;  %v5249_v41 = vld [vmem:[#allocation2 + $0x2f8] sm:$0xff]  }
  0x4d   :  { %4850 = vmatprep.subr.bf16.mxu1 %v5189_v43  ;;  %1819 = vmatprep.mubr.bf16.mxu0 %v4352_v8  ;;  %v5250_v42 = vld [vmem:[#allocation2 + $0x238] sm:$0xff]   ;;  %v5278_v8 = vld [vmem:[#allocation2 + $0x328] sm:$0xff]  }
  0x4e   :  { %1859 = vmatprep.mubr.bf16.mxu1 %v4354_v11  ;;  %v5251_v43 = vld [vmem:[#allocation2 + $0x2b8] sm:$0xff]   ;;  %v5281_v11 = vld [vmem:[#allocation2 + $0x3f0] sm:$0xff]  }
  0x4f   :  { %4829 = vmatpush3.bf16.msra.mxu0 %v5190_v44  ;;  %v72_v44 = vld [vmem:[%s5886_s0 + $0x20] sm:$0xff] }
  0x50   :  { %4851 = vmatpush3.bf16.msra.mxu1 %v5191_v45  ;;  %4830 = vmatprep.subr.bf16.mxu0 %v5192_v46  ;;  %v73_v45 = vld [vmem:[%s5886_s0 + $0x28] sm:$0xff]  ;;  %v4355_v46 = vcombine.low %v72_v44, %v72_v44 }
  0x51   :  { %4852 = vmatprep.subr.bf16.mxu1 %v5193_v47  ;;  %v4356_v47 = vcombine.high %v72_v44, %v72_v44  ;;  %v5312_v44 = vld [vmem:[#allocation2 + $0x468] sm:$0xff]  }
  0x53   :  { %4831 = vmatpush3.bf16.msra.mxu0 %v5194_v48  ;;  %v4357_v48 = vcombine.low %v73_v45, %v73_v45 }
  0x54   :  { %4853 = vmatpush3.bf16.msra.mxu1 %v5195_v49  ;;  %4832 = vmatprep.subr.bf16.mxu0 %v5196_v50  ;;  %v4358_v49 = vcombine.high %v73_v45, %v73_v45  ;;  %v5256_v50 = vld [vmem:[#allocation2 + $0x340] sm:$0xff]   ;;  %v5313_v45 = vld [vmem:[#allocation2 + $0x4e8] sm:$0xff]  }
  0x55   :  { %4854 = vmatprep.subr.bf16.mxu1 %v5197_v51  ;;  %v5257_v51 = vld [vmem:[#allocation2 + $0x3c0] sm:$0xff]  }
  0x57   :  { %4833 = vmatpush3.bf16.msra.mxu0 %v5198_v52  ;;  %v5258_v52 = vld [vmem:[#allocation2 + $0x300] sm:$0xff]  }
  0x58   :  { %4855 = vmatpush3.bf16.msra.mxu1 %v5199_v53  ;;  %4834 = vmatprep.subr.bf16.mxu0 %v5200_v54  ;;  %v5259_v53 = vld [vmem:[#allocation2 + $0x380] sm:$0xff]   ;;  %v5260_v54 = vld [vmem:[#allocation2 + $0x348] sm:$0xff]  }
  0x59   :  { %4856 = vmatprep.subr.bf16.mxu1 %v5201_v55  ;;  %v5261_v55 = vld [vmem:[#allocation2 + $0x3c8] sm:$0xff]  }
  0x5b   :  { %4835 = vmatpush3.bf16.msra.mxu0 %v5202_v56  ;;  %v5262_v56 = vld [vmem:[#allocation2 + $0x308] sm:$0xff]  }
  0x5c   :  { %4857 = vmatpush3.bf16.msra.mxu1 %v5203_v57  ;;  %4836 = vmatprep.subr.bf16.mxu0 %v5204_v58  ;;  %v5263_v57 = vld [vmem:[#allocation2 + $0x388] sm:$0xff]   ;;  %v5264_v58 = vld [vmem:[#allocation2 + $0x350] sm:$0xff]  }
  0x5d   :  { %4858 = vmatprep.subr.bf16.mxu1 %v5205_v59  ;;  %v5265_v59 = vld [vmem:[#allocation2 + $0x3d0] sm:$0xff]  }
  0x5f   :  { %4837 = vmatpush3.bf16.msra.mxu0 %v5206_v60  ;;  %v5266_v60 = vld [vmem:[#allocation2 + $0x310] sm:$0xff]  }
  0x60   :  { %4859 = vmatpush3.bf16.msra.mxu1 %v5207_v61  ;;  %4838 = vmatprep.subr.bf16.mxu0 %v5208_v62  ;;  %v5267_v61 = vld [vmem:[#allocation2 + $0x390] sm:$0xff]   ;;  %v5268_v62 = vld [vmem:[#allocation2 + $0x358] sm:$0xff]  }
  0x61   :  { %4860 = vmatprep.subr.bf16.mxu1 %v5209_v63  ;;  %v5269_v63 = vld [vmem:[#allocation2 + $0x3d8] sm:$0xff]  }
  0x63   :  { %4839 = vmatpush3.bf16.msra.mxu0 %v5210_v0  ;;  %v5270_v0 = vld [vmem:[#allocation2 + $0x318] sm:$0xff]  }
  0x64   :  { %4861 = vmatpush3.bf16.msra.mxu1 %v5211_v1  ;;  %4840 = vmatprep.subr.bf16.mxu0 %v5212_v2  ;;  %v5271_v1 = vld [vmem:[#allocation2 + $0x398] sm:$0xff]   ;;  %v5272_v2 = vld [vmem:[#allocation2 + $0x360] sm:$0xff]  }
  0x65   :  { %4862 = vmatprep.subr.bf16.mxu1 %v5213_v3  ;;  %v5273_v3 = vld [vmem:[#allocation2 + $0x3e0] sm:$0xff]  }
  0x67   :  { %4841 = vmatpush3.bf16.msra.mxu0 %v5214_v4  ;;  %v5274_v4 = vld [vmem:[#allocation2 + $0x320] sm:$0xff]  }
  0x68   :  { %4863 = vmatpush3.bf16.msra.mxu1 %v5215_v5  ;;  %4870 = vmatprep.subr.bf16.mxu0 %v5220_v12  ;;  %v5275_v5 = vld [vmem:[#allocation2 + $0x3a0] sm:$0xff]   ;;  %v5282_v12 = vld [vmem:[#allocation2 + $0x330] sm:$0xff]  }
  0x69   :  { %4892 = vmatprep.subr.bf16.mxu1 %v5221_v13  ;;  %v5283_v13 = vld [vmem:[#allocation2 + $0x3b0] sm:$0xff]  }
  0x6a   :  { %1820 = vmatmul.mubr.bf16.vlgmr.msra.gmra.mrb[4].mxu0 %v4351_v7  ;;  %v5277_v7 = vld [vmem:[#allocation2 + $0x3e8] sm:$0xff]  }
  0x6b   :  { %1860 = vmatmul.mubr.bf16.vlgmr.msra.gmra.mrb[4].mxu1 %v4353_v10  ;;  %4871 = vmatpush3.bf16.msra.mxu0 %v5222_v14  ;;  %v5280_v10 = vld [vmem:[#allocation2 + $0x370] sm:$0xff]   ;;  %v5284_v14 = vld [vmem:[#allocation2 + $0x378] sm:$0xff]  }
  0x6c   :  { %4893 = vmatpush3.bf16.msra.mxu1 %v5223_v15  ;;  %4872 = vmatprep.subr.bf16.mxu0 %v5224_v16  ;;  %v5285_v15 = vld [vmem:[#allocation2 + $0x3f8] sm:$0xff]  }
  0x6d   :  { %4894 = vmatprep.subr.bf16.mxu1 %v5225_v17  ;;  %1899 = vmatprep.mubr.bf16.mxu0 %v4356_v47  ;;  %v5286_v16 = vld [vmem:[#allocation2 + $0x338] sm:$0xff]   ;;  %v5315_v47 = vld [vmem:[#allocation2 + $0x4a8] sm:$0xff]  }
  0x6e   :  { %1939 = vmatprep.mubr.bf16.mxu1 %v4358_v49  ;;  %v5287_v17 = vld [vmem:[#allocation2 + $0x3b8] sm:$0xff]   ;;  %v5317_v49 = vld [vmem:[#allocation2 + $0x4f0] sm:$0xff]  }
  0x6f   :  { %4873 = vmatpush3.bf16.msra.mxu0 %v5226_v18  ;;  %v74_v18 = vld [vmem:[%s5886_s0 + $0x30] sm:$0xff] }
  0x70   :  { %4895 = vmatpush3.bf16.msra.mxu1 %v5227_v19  ;;  %4874 = vmatprep.subr.bf16.mxu0 %v5228_v20  ;;  %v75_v19 = vld [vmem:[%s5886_s0 + $0x38] sm:$0xff]  ;;  %v4359_v20 = vcombine.low %v74_v18, %v74_v18 }
  0x71   :  { %4896 = vmatprep.subr.bf16.mxu1 %v5229_v21  ;;  %v4360_v21 = vcombine.high %v74_v18, %v74_v18  ;;  %v5348_v18 = vld [vmem:[#allocation2 + $0x568] sm:$0xff]  }
  0x73   :  { %4875 = vmatpush3.bf16.msra.mxu0 %v5230_v22  ;;  %v4361_v22 = vcombine.low %v75_v19, %v75_v19 }
  0x74   :  { %4897 = vmatpush3.bf16.msra.mxu1 %v5231_v23  ;;  %4876 = vmatprep.subr.bf16.mxu0 %v5232_v24  ;;  %v5292_v23 = vld [vmem:[#allocation2 + $0x440] sm:$0xff]   ;;  %v4362_v24 = vcombine.high %v75_v19, %v75_v19  ;;  %v5349_v19 = vld [vmem:[#allocation2 + $0x5e8] sm:$0xff]  }
  0x75   :  { %4898 = vmatprep.subr.bf16.mxu1 %v5233_v25  ;;  %v5293_v25 = vld [vmem:[#allocation2 + $0x4c0] sm:$0xff]  }
  0x77   :  { %4877 = vmatpush3.bf16.msra.mxu0 %v5234_v26  ;;  %v5294_v26 = vld [vmem:[#allocation2 + $0x400] sm:$0xff]  }
  0x78   :  { %4899 = vmatpush3.bf16.msra.mxu1 %v5235_v27  ;;  %4878 = vmatprep.subr.bf16.mxu0 %v5236_v28  ;;  %v5295_v27 = vld [vmem:[#allocation2 + $0x480] sm:$0xff]   ;;  %v5296_v28 = vld [vmem:[#allocation2 + $0x448] sm:$0xff]  }
  0x79   :  { %4900 = vmatprep.subr.bf16.mxu1 %v5237_v29  ;;  %v5297_v29 = vld [vmem:[#allocation2 + $0x4c8] sm:$0xff]  }
  0x7b   :  { %4879 = vmatpush3.bf16.msra.mxu0 %v5238_v30  ;;  %v5298_v30 = vld [vmem:[#allocation2 + $0x408] sm:$0xff]  }
  0x7c   :  { %4901 = vmatpush3.bf16.msra.mxu1 %v5239_v31  ;;  %4880 = vmatprep.subr.bf16.mxu0 %v5240_v32  ;;  %v5299_v31 = vld [vmem:[#allocation2 + $0x488] sm:$0xff]   ;;  %v5300_v32 = vld [vmem:[#allocation2 + $0x450] sm:$0xff]  }
  0x7d   :  { %4902 = vmatprep.subr.bf16.mxu1 %v5241_v33  ;;  %v5301_v33 = vld [vmem:[#allocation2 + $0x4d0] sm:$0xff]  }
  0x7f   :  { %4881 = vmatpush3.bf16.msra.mxu0 %v5242_v34  ;;  %v5302_v34 = vld [vmem:[#allocation2 + $0x410] sm:$0xff]  }
  0x80   :  { %4903 = vmatpush3.bf16.msra.mxu1 %v5243_v35  ;;  %4882 = vmatprep.subr.bf16.mxu0 %v5244_v36  ;;  %v5303_v35 = vld [vmem:[#allocation2 + $0x490] sm:$0xff]   ;;  %v5304_v36 = vld [vmem:[#allocation2 + $0x458] sm:$0xff]  }
  0x81   :  { %4904 = vmatprep.subr.bf16.mxu1 %v5245_v37  ;;  %v5305_v37 = vld [vmem:[#allocation2 + $0x4d8] sm:$0xff]  }
  0x83   :  { %4883 = vmatpush3.bf16.msra.mxu0 %v5246_v38  ;;  %v5306_v38 = vld [vmem:[#allocation2 + $0x418] sm:$0xff]  }
  0x84   :  { %4905 = vmatpush3.bf16.msra.mxu1 %v5247_v39  ;;  %4884 = vmatprep.subr.bf16.mxu0 %v5248_v40  ;;  %v5307_v39 = vld [vmem:[#allocation2 + $0x498] sm:$0xff]   ;;  %v5308_v40 = vld [vmem:[#allocation2 + $0x460] sm:$0xff]  }
  0x85   :  { %4906 = vmatprep.subr.bf16.mxu1 %v5249_v41  ;;  %v5309_v41 = vld [vmem:[#allocation2 + $0x4e0] sm:$0xff]  }
  0x87   :  { %4885 = vmatpush3.bf16.msra.mxu0 %v5250_v42  ;;  %v5310_v42 = vld [vmem:[#allocation2 + $0x420] sm:$0xff]  }
  0x88   :  { %4907 = vmatpush3.bf16.msra.mxu1 %v5251_v43  ;;  %4914 = vmatprep.subr.bf16.mxu0 %v5256_v50  ;;  %v5311_v43 = vld [vmem:[#allocation2 + $0x4a0] sm:$0xff]   ;;  %v5318_v50 = vld [vmem:[#allocation2 + $0x430] sm:$0xff]  }
  0x89   :  { %4936 = vmatprep.subr.bf16.mxu1 %v5257_v51  ;;  %v5319_v51 = vld [vmem:[#allocation2 + $0x4b0] sm:$0xff]  }
  0x8a   :  { %1900 = vmatmul.mubr.bf16.vlgmr.msra.gmra.mrb[8].mxu0 %v4355_v46  ;;  %v5314_v46 = vld [vmem:[#allocation2 + $0x428] sm:$0xff]  }
  0x8b   :  { %1940 = vmatmul.mubr.bf16.vlgmr.msra.gmra.mrb[8].mxu1 %v4357_v48  ;;  %4915 = vmatpush3.bf16.msra.mxu0 %v5258_v52  ;;  %v5316_v48 = vld [vmem:[#allocation2 + $0x470] sm:$0xff]   ;;  %v5320_v52 = vld [vmem:[#allocation2 + $0x478] sm:$0xff]  }
  0x8c   :  { %4937 = vmatpush3.bf16.msra.mxu1 %v5259_v53  ;;  %4916 = vmatprep.subr.bf16.mxu0 %v5260_v54  ;;  %v5321_v53 = vld [vmem:[#allocation2 + $0x4f8] sm:$0xff]  }
  0x8d   :  { %4938 = vmatprep.subr.bf16.mxu1 %v5261_v55  ;;  %1979 = vmatprep.mubr.bf16.mxu0 %v4360_v21  ;;  %v5322_v54 = vld [vmem:[#allocation2 + $0x438] sm:$0xff]   ;;  %v5351_v21 = vld [vmem:[#allocation2 + $0x5a8] sm:$0xff]  }
  0x8e   :  { %2019 = vmatprep.mubr.bf16.mxu1 %v4362_v24  ;;  %v5323_v55 = vld [vmem:[#allocation2 + $0x4b8] sm:$0xff]   ;;  %v5354_v24 = vld [vmem:[#allocation2 + $0x530] sm:$0xff]  }
  0x8f   :  { %4917 = vmatpush3.bf16.msra.mxu0 %v5262_v56  ;;  %v76_v56 = vld [vmem:[%s5886_s0 + $0x40] sm:$0xff] }
  0x90   :  { %4939 = vmatpush3.bf16.msra.mxu1 %v5263_v57  ;;  %4918 = vmatprep.subr.bf16.mxu0 %v5264_v58  ;;  %v4363_v57 = vcombine.low %v76_v56, %v76_v56  ;;  %v4364_v58 = vcombine.high %v76_v56, %v76_v56  ;;  %v2192_v56 = vld [vmem:[%s5890_s4 + $0x20] sm:$0xff] }
  0x91   :  { %4940 = vmatprep.subr.bf16.mxu1 %v5265_v59  ;;  %v77_v59 = vld [vmem:[%s5886_s0 + $0x48] sm:$0xff] }
  0x93   :  { %4919 = vmatpush3.bf16.msra.mxu0 %v5266_v60  ;;  %v4365_v60 = vcombine.low %v77_v59, %v77_v59 }
  0x94   :  { %4941 = vmatpush3.bf16.msra.mxu1 %v5267_v61  ;;  %4920 = vmatprep.subr.bf16.mxu0 %v5268_v62  ;;  %v4366_v61 = vcombine.high %v77_v59, %v77_v59  ;;  %v5328_v62 = vld [vmem:[#allocation2 + $0x540] sm:$0xff]   ;;  %v2194_v59 = vld [vmem:[%s5890_s4 + $0x30] sm:$0xff] }
  0x95   :  { %4942 = vmatprep.subr.bf16.mxu1 %v5269_v63  ;;  %v5329_v63 = vld [vmem:[#allocation2 + $0x5c0] sm:$0xff]  }
  0x97   :  { %4921 = vmatpush3.bf16.msra.mxu0 %v5270_v0  ;;  %v5330_v0 = vld [vmem:[#allocation2 + $0x500] sm:$0xff]  }
  0x98   :  { %4943 = vmatpush3.bf16.msra.mxu1 %v5271_v1  ;;  %4922 = vmatprep.subr.bf16.mxu0 %v5272_v2  ;;  %v5331_v1 = vld [vmem:[#allocation2 + $0x580] sm:$0xff]   ;;  %v5332_v2 = vld [vmem:[#allocation2 + $0x548] sm:$0xff]  }
  0x99   :  { %4944 = vmatprep.subr.bf16.mxu1 %v5273_v3  ;;  %v5333_v3 = vld [vmem:[#allocation2 + $0x5c8] sm:$0xff]  }
  0x9b   :  { %4923 = vmatpush3.bf16.msra.mxu0 %v5274_v4  ;;  %v5334_v4 = vld [vmem:[#allocation2 + $0x508] sm:$0xff]  }
  0x9c   :  { %4945 = vmatpush3.bf16.msra.mxu1 %v5275_v5  ;;  %4924 = vmatprep.subr.bf16.mxu0 %v5276_v6  ;;  %v5335_v5 = vld [vmem:[#allocation2 + $0x588] sm:$0xff]   ;;  %v5336_v6 = vld [vmem:[#allocation2 + $0x550] sm:$0xff]  }
  0x9d   :  { %4946 = vmatprep.subr.bf16.mxu1 %v5277_v7  ;;  %v5337_v7 = vld [vmem:[#allocation2 + $0x5d0] sm:$0xff]  }
  0x9f   :  { %4925 = vmatpush3.bf16.msra.mxu0 %v5278_v8  ;;  %v5338_v8 = vld [vmem:[#allocation2 + $0x510] sm:$0xff]  }
  0xa0   :  { %4947 = vmatpush3.bf16.msra.mxu1 %v5279_v9  ;;  %4926 = vmatprep.subr.bf16.mxu0 %v5280_v10  ;;  %v5339_v9 = vld [vmem:[#allocation2 + $0x590] sm:$0xff]   ;;  %v5340_v10 = vld [vmem:[#allocation2 + $0x558] sm:$0xff]  }
  0xa1   :  { %4948 = vmatprep.subr.bf16.mxu1 %v5281_v11  ;;  %v5341_v11 = vld [vmem:[#allocation2 + $0x5d8] sm:$0xff]  }
  0xa3   :  { %4927 = vmatpush3.bf16.msra.mxu0 %v5282_v12  ;;  %v5342_v12 = vld [vmem:[#allocation2 + $0x518] sm:$0xff]  }
  0xa4   :  { %4949 = vmatpush3.bf16.msra.mxu1 %v5283_v13  ;;  %4928 = vmatprep.subr.bf16.mxu0 %v5284_v14  ;;  %v5343_v13 = vld [vmem:[#allocation2 + $0x598] sm:$0xff]   ;;  %v5344_v14 = vld [vmem:[#allocation2 + $0x560] sm:$0xff]  }
  0xa5   :  { %4950 = vmatprep.subr.bf16.mxu1 %v5285_v15  ;;  %v5345_v15 = vld [vmem:[#allocation2 + $0x5e0] sm:$0xff]  }
  0xa7   :  { %4929 = vmatpush3.bf16.msra.mxu0 %v5286_v16  ;;  %v5346_v16 = vld [vmem:[#allocation2 + $0x520] sm:$0xff]  }
  0xa8   :  { %4951 = vmatpush3.bf16.msra.mxu1 %v5287_v17  ;;  %4958 = vmatprep.subr.bf16.mxu0 %v5292_v23  ;;  %v5347_v17 = vld [vmem:[#allocation2 + $0x5a0] sm:$0xff]   ;;  %v5353_v23 = vld [vmem:[#allocation2 + $0x5f0] sm:$0xff]  }
  0xa9   :  { %4980 = vmatprep.subr.bf16.mxu1 %v5293_v25  ;;  %v5355_v25 = vld [vmem:[#allocation2 + $0x5b0] sm:$0xff]  }
  0xaa   :  { %1980 = vmatmul.mubr.bf16.vlgmr.msra.gmra.mrb[12].mxu0 %v4359_v20  ;;  %v5350_v20 = vld [vmem:[#allocation2 + $0x528] sm:$0xff]  }
  0xab   :  { %2020 = vmatmul.mubr.bf16.vlgmr.msra.gmra.mrb[12].mxu1 %v4361_v22  ;;  %4959 = vmatpush3.bf16.msra.mxu0 %v5294_v26  ;;  %v5352_v22 = vld [vmem:[#allocation2 + $0x570] sm:$0xff]   ;;  %v5356_v26 = vld [vmem:[#allocation2 + $0x578] sm:$0xff]  }
  0xac   :  { %4981 = vmatpush3.bf16.msra.mxu1 %v5295_v27  ;;  %4960 = vmatprep.subr.bf16.mxu0 %v5296_v28  ;;  %v5357_v27 = vld [vmem:[#allocation2 + $0x5f8] sm:$0xff]  }
  0xad   :  { %4982 = vmatprep.subr.bf16.mxu1 %v5297_v29  ;;  %2059 = vmatprep.mubr.bf16.mxu0 %v4364_v58  ;;  %v5358_v28 = vld [vmem:[#allocation2 + $0x538] sm:$0xff]  }
  0xae   :  { %2099 = vmatprep.mubr.bf16.mxu1 %v4366_v61  ;;  %v5359_v29 = vld [vmem:[#allocation2 + $0x5b8] sm:$0xff]  }
  0xaf   :  { %4961 = vmatpush3.bf16.msra.mxu0 %v5298_v30  ;;  %v78_v30 = vld [vmem:[%s5886_s0 + $0x50] sm:$0xff] }
  0xb0   :  { %4983 = vmatpush3.bf16.msra.mxu1 %v5299_v31  ;;  %4962 = vmatprep.subr.bf16.mxu0 %v5300_v32  ;;  %v79_v31 = vld [vmem:[%s5886_s0 + $0x58] sm:$0xff]  ;;  %v4367_v32 = vcombine.low %v78_v30, %v78_v30 }
  0xb1   :  { %4984 = vmatprep.subr.bf16.mxu1 %v5301_v33  ;;  %v4368_v33 = vcombine.high %v78_v30, %v78_v30 }
  0xb3   :  { %4963 = vmatpush3.bf16.msra.mxu0 %v5302_v34  ;;  %v4369_v34 = vcombine.low %v79_v31, %v79_v31 }
  0xb4   :  { %4985 = vmatpush3.bf16.msra.mxu1 %v5303_v35  ;;  %4964 = vmatprep.subr.bf16.mxu0 %v5304_v36  ;;  %v4370_v35 = vcombine.high %v79_v31, %v79_v31 }
  0xb5   :  { %4986 = vmatprep.subr.bf16.mxu1 %v5305_v37 }
  0xb7   :  { %4965 = vmatpush3.bf16.msra.mxu0 %v5306_v38  ;;  %v4346_v38 = vld [vmem:[%s5889_s3] ss:$0 sm:$0xff] }
  0xb8   :  { %4987 = vmatpush3.bf16.msra.mxu1 %v5307_v39  ;;  %4966 = vmatprep.subr.bf16.mxu0 %v5308_v40 }
  0xb9   :  { %4988 = vmatprep.subr.bf16.mxu1 %v5309_v41 }
  0xbb   :  { %4967 = vmatpush3.bf16.msra.mxu0 %v5310_v42 }
  0xbc   :  { %4989 = vmatpush3.bf16.msra.mxu1 %v5311_v43  ;;  %4968 = vmatprep.subr.bf16.mxu0 %v5312_v44 }
  0xbd   :  { %4990 = vmatprep.subr.bf16.mxu1 %v5313_v45 }
  0xbf   :  { %4969 = vmatpush3.bf16.msra.mxu0 %v5314_v46 }
  0xc0   :  { %4991 = vmatpush3.bf16.msra.mxu1 %v5315_v47  ;;  %4970 = vmatprep.subr.bf16.mxu0 %v5316_v48 }
  0xc1   :  { %4992 = vmatprep.subr.bf16.mxu1 %v5317_v49  ;;  %v2188_v49 = vld [vmem:[%s5890_s4] sm:$0xff] }
  0xc3   :  { %4971 = vmatpush3.bf16.msra.mxu0 %v5318_v50  ;;  %v2189_v50 = vld [vmem:[%s5890_s4 + $0x8] sm:$0xff] }
  0xc4   :  { %4993 = vmatpush3.bf16.msra.mxu1 %v5319_v51  ;;  %4972 = vmatprep.subr.bf16.mxu0 %v5320_v52  ;;  %v2190_v51 = vld [vmem:[%s5890_s4 + $0x10] sm:$0xff]  ;;  %v5564_v52 = vmov 0.0|0.0  }
  0xc5   :  { %4994 = vmatprep.subr.bf16.mxu1 %v5321_v53  ;;  %v5109_v53 = vpack.c.bf16 %v2189_v50, %v2188_v49 }
  0xc7   :  { %4973 = vmatpush3.bf16.msra.mxu0 %v5322_v54  ;;  %v2191_v54 = vld [vmem:[%s5890_s4 + $0x18] sm:$0xff] }
  0xc8   :  { %4995 = vmatpush3.bf16.msra.mxu1 %v5323_v55  ;;  %5002 = vmatprep.subr.bf16.mxu0 %v5328_v62  ;;  %v5112_v55 = vpack.c.bf16 %v2191_v54, %v2190_v51  ;;  %v2196_v62 = vld [vmem:[%s5890_s4 + $0x40] sm:$0xff] }
  0xc9   :  { %5024 = vmatprep.subr.bf16.mxu1 %v5329_v63  ;;  %v2197_v63 = vld [vmem:[%s5890_s4 + $0x48] sm:$0xff] }
  0xca   :  { %2060 = vmatmul.mubr.bf16.vlgmr.msra.gmra.mrb[16].mxu0 %v4363_v57  ;;  %v2193_v57 = vld [vmem:[%s5890_s4 + $0x28] sm:$0xff] }
  0xcb   :  { %2100 = vmatmul.mubr.bf16.vlgmr.msra.gmra.mrb[16].mxu1 %v4365_v60  ;;  %5003 = vmatpush3.bf16.msra.mxu0 %v5330_v0  ;;  %v5115_v58 = vpack.c.bf16 %v2193_v57, %v2192_v56  ;;  %v2195_v60 = vld [vmem:[%s5890_s4 + $0x38] sm:$0xff]  ;;  %v5121_v0 = vpack.c.bf16 %v2197_v63, %v2196_v62 }
  0xcc   :  { %5025 = vmatpush3.bf16.msra.mxu1 %v5331_v1  ;;  %5004 = vmatprep.subr.bf16.mxu0 %v5332_v2  ;;  %v5118_v61 = vpack.c.bf16 %v2195_v60, %v2194_v59  ;;  %v2198_v1 = vld [vmem:[%s5890_s4 + $0x50] sm:$0xff]  ;;  %v2199_v2 = vld [vmem:[%s5890_s4 + $0x58] sm:$0xff] }
  0xcd   :  { %5026 = vmatprep.subr.bf16.mxu1 %v5333_v3  ;;  %2139 = vmatprep.mubr.bf16.mxu0 %v4368_v33  ;;  %v5124_v3 = vpack.c.bf16 %v2199_v2, %v2198_v1 }
  0xce   :  { %2179 = vmatprep.mubr.bf16.mxu1 %v4370_v35 }
  0xcf   :  { %5005 = vmatpush3.bf16.msra.mxu0 %v5334_v4 }
  0xd0   :  { %5027 = vmatpush3.bf16.msra.mxu1 %v5335_v5  ;;  %5006 = vmatprep.subr.bf16.mxu0 %v5336_v6 }
  0xd1   :  { %5028 = vmatprep.subr.bf16.mxu1 %v5337_v7 }
  0xd3   :  { %5007 = vmatpush3.bf16.msra.mxu0 %v5338_v8 }
  0xd4   :  { %5029 = vmatpush3.bf16.msra.mxu1 %v5339_v9  ;;  %5008 = vmatprep.subr.bf16.mxu0 %v5340_v10 }
  0xd5   :  { %5030 = vmatprep.subr.bf16.mxu1 %v5341_v11 }
  0xd7   :  { %5009 = vmatpush3.bf16.msra.mxu0 %v5342_v12 }
  0xd8   :  { %5031 = vmatpush3.bf16.msra.mxu1 %v5343_v13  ;;  %5010 = vmatprep.subr.bf16.mxu0 %v5344_v14  ;;  %v2200_v14 = vld [vmem:[%s5890_s4 + $0x60] sm:$0xff] }
  0xd9   :  { %5032 = vmatprep.subr.bf16.mxu1 %v5345_v15  ;;  %v2201_v15 = vld [vmem:[%s5890_s4 + $0x68] sm:$0xff] }
  0xdb   :  { %5011 = vmatpush3.bf16.msra.mxu0 %v5346_v16 }
  0xdc   :  { %5033 = vmatpush3.bf16.msra.mxu1 %v5347_v17  ;;  %5012 = vmatprep.subr.bf16.mxu0 %v5348_v18  ;;  %v5127_v17 = vpack.c.bf16 %v2201_v15, %v2200_v14 }
  0xdd   :  { %5034 = vmatprep.subr.bf16.mxu1 %v5349_v19  ;;  %v2202_v19 = vld [vmem:[%s5890_s4 + $0x70] sm:$0xff] }
  0xdf   :  { %5013 = vmatpush3.bf16.msra.mxu0 %v5350_v20  ;;  %v2203_v20 = vld [vmem:[%s5890_s4 + $0x78] sm:$0xff] }
  0xe0   :  { %5035 = vmatpush3.bf16.msra.mxu1 %v5351_v21  ;;  %5014 = vmatprep.subr.bf16.mxu0 %v5352_v22  ;;  %v5130_v21 = vpack.c.bf16 %v2203_v20, %v2202_v19  ;;  %v5566_v22 = vmov 0.0   ;;  %v2377_v19 = vld [vmem:[#allocation5 + $0x8] sm:$0xff] }
  0xe1   :  { %5036 = vmatprep.subr.bf16.mxu1 %v5353_v23 }
  0xe3   :  { %5015 = vmatpush3.bf16.msra.mxu0 %v5354_v24 }
  0xe4   :  { %5037 = vmatpush3.bf16.msra.mxu1 %v5355_v25  ;;  %5016 = vmatprep.subr.bf16.mxu0 %v5356_v26 }
  0xe5   :  { %5038 = vmatprep.subr.bf16.mxu1 %v5357_v27 }
  0xe7   :  { %5017 = vmatpush3.bf16.msra.mxu0 %v5358_v28 }
  0xe8   :  { %5039 = vmatpush3.bf16.msra.mxu1 %v5359_v29  ;;  %5108 = vmatprep.subr.bf16.mxu0 %v5564_v52 }
  0xe9   :  { %5132 = vmatprep.subr.bf16.mxu1 %v5564_v52 }
  0xea   :  { %2140 = vmatmul.mubr.bf16.vlgmr.msra.gmra.mrb[20].mxu0 %v4367_v32 }
  0xeb   :  { %2180 = vmatmul.mubr.bf16.vlgmr.msra.gmra.mrb[20].mxu1 %v4369_v34  ;;  %5110 = vmatpush3.bf16.msra.mxu0 %v5109_v53 }
  0xec   :  { %5111 = vmatprep.subr.bf16.mxu0 %v5564_v52  ;;  %5098 = vmatprep.mubr.msk.f32.mxu0 %vm5565_vm0, %v5566_v22 }
  0xed   :  { %5105 = vmatprep.mubr.msk.f32.mxu1 %vm5565_vm0, %v5566_v22  ;;  %v2389_v22 = vld [vmem:[#allocation5 + $0x68] sm:$0xff] }
  0xef   :  { %5113 = vmatpush3.bf16.msra.mxu0 %v5112_v55 }
  0xf0   :  { %5114 = vmatprep.subr.bf16.mxu0 %v5564_v52 }
  0xf3   :  { %5116 = vmatpush3.bf16.msra.mxu0 %v5115_v58 }
  0xf4   :  { %5117 = vmatprep.subr.bf16.mxu0 %v5564_v52 }
  0xf7   :  { %5119 = vmatpush3.bf16.msra.mxu0 %v5118_v61 }
  0xf8   :  { %5120 = vmatprep.subr.bf16.mxu0 %v5564_v52 }
  0xfb   :  { %5122 = vmatpush3.bf16.msra.mxu0 %v5121_v0 }
  0xfc   :  { %5123 = vmatprep.subr.bf16.mxu0 %v5564_v52 }
  0xff   :  { %5125 = vmatpush3.bf16.msra.mxu0 %v5124_v3 }
 0x100   :  { %5126 = vmatprep.subr.bf16.mxu0 %v5564_v52 }
 0x103   :  { %5128 = vmatpush3.bf16.msra.mxu0 %v5127_v17  ;;  %v2376_v17 = vld [vmem:[#allocation5] sm:$0xff] }
 0x104   :  { %5129 = vmatprep.subr.bf16.mxu0 %v5564_v52 }
 0x107   :  { %5131 = vmatpush3.bf16.msra.mxu0 %v5130_v21 }
 0x11d   :  { %v4798_v36 = vpop.f32.mrb[0].mxu0 }
 0x11e   :  { %v4820_v37 = vpop.f32.mrb[0].mxu1  ;;  %v4799_v39 = vpop.f32.mrb[1].mxu0 }
 0x11f   :  { %v4821_v40 = vpop.f32.mrb[1].mxu1  ;;  %v4800_v41 = vadd.f32 %v4799_v39, %v4798_v36  ;;  %v4801_v43 = vpop.f32.mrb[2].mxu0 }
 0x120   :  { %v4822_v42 = vadd.f32 %v4821_v40, %v4820_v37  ;;  %v4823_v44 = vpop.f32.mrb[2].mxu1  ;;  %v4802_v45 = vpop.f32.mrb[3].mxu0 }
 0x121   :  { %v4824_v46 = vpop.f32.mrb[3].mxu1  ;;  %v1742_v47 = vadd.f32 %v4800_v41, %v4346_v38 }
 0x123   :  { %v1782_v48 = vadd.f32 %v4822_v42, %v1742_v47 }
 0x13d   :  { %v4842_v4 = vpop.f32.mrb[4].mxu0 }
 0x13e   :  { %v4864_v5 = vpop.f32.mrb[4].mxu1  ;;  %v4843_v6 = vpop.f32.mrb[5].mxu0 }
 0x13f   :  { %v4865_v7 = vpop.f32.mrb[5].mxu1  ;;  %v4844_v8 = vadd.f32 %v4843_v6, %v4842_v4  ;;  %v4845_v10 = vpop.f32.mrb[6].mxu0 }
 0x140   :  { %v4866_v9 = vadd.f32 %v4865_v7, %v4864_v5  ;;  %v4867_v11 = vpop.f32.mrb[6].mxu1  ;;  %v4846_v12 = vpop.f32.mrb[7].mxu0 }
 0x141   :  { %v4868_v13 = vpop.f32.mrb[7].mxu1  ;;  %v1822_v16 = vadd.f32 %v4844_v8, %v1782_v48  ;;  %v2291_v8 = vld [vmem:[%s5892_s6] sm:$0xff] }
 0x142   :  { %v4563_v11 = vld [vmem:[%s5891_s5] ss:$0 sm:$0xff]  ;;  %s5567_s5 = smov 112  }
 0x143   :  { %v1862_v18 = vadd.f32 %v4866_v9, %v1822_v16  ;;  %v2292_v9 = vld [vmem:[%s5892_s6 + $0x8] sm:$0xff] }
 0x144   :  { %v5133_v10 = vpack.c.bf16 %v2292_v9, %v2291_v8  ;;  %v2520_v9 = vld [vmem:[#allocation5 + $0x480] sm:$0xff] }
 0x146   :  { %5134 = vmatpush3.bf16.msra.mxu1 %v5133_v10  ;;  %v2532_v10 = vld [vmem:[#allocation5 + $0x4e0] sm:$0xff] }
 0x15d   :  { %v4886_v23 = vpop.f32.mrb[8].mxu0 }
 0x15e   :  { %v4908_v24 = vpop.f32.mrb[8].mxu1  ;;  %v4887_v25 = vpop.f32.mrb[9].mxu0 }
 0x15f   :  { %v4888_v26 = vadd.f32 %v4887_v25, %v4886_v23  ;;  %v4909_v27 = vpop.f32.mrb[9].mxu1  ;;  %v4889_v28 = vpop.f32.mrb[10].mxu0  ;;  %v4568_v23 = vcombine.low %v2377_v19, %v2389_v22  ;;  %v2401_v25 = vld [vmem:[#allocation5 + $0xc8] sm:$0xff] }
 0x160   :  { %v4910_v29 = vadd.f32 %v4909_v27, %v4908_v24  ;;  %v4911_v30 = vpop.f32.mrb[10].mxu1  ;;  %v4890_v31 = vpop.f32.mrb[11].mxu0  ;;  %v4569_v24 = vcombine.high %v2377_v19, %v2389_v22  ;;  %v2378_v22 = vld [vmem:[#allocation5 + $0x10] sm:$0xff] }
 0x161   :  { %v1902_v32 = vadd.f32 %v4888_v26, %v1862_v18  ;;  %v4912_v33 = vpop.f32.mrb[11].mxu1  ;;  %v2388_v18 = vld [vmem:[#allocation5 + $0x60] sm:$0xff]  ;;  %v2413_v26 = vld [vmem:[#allocation5 + $0x128] sm:$0xff] }
 0x162   :  { %v4566_v20 = vcombine.low %v2376_v17, %v2388_v18  ;;  %v4567_v21 = vcombine.high %v2376_v17, %v2388_v18  ;;  %v4593_v27 = vcombine.high %v2401_v25, %v2413_v26  ;;  %3695 = vmatprep.subr.bf16.mxu0 %v4569_v24  ;;  %v4592_v28 = vcombine.low %v2401_v25, %v2413_v26  ;;  %v2437_v30 = vld [vmem:[#allocation5 + $0x1e8] sm:$0xff]  ;;  %v2379_v24 = vld [vmem:[#allocation5 + $0x18] sm:$0xff] }
 0x163   :  { %v1942_v34 = vadd.f32 %v4910_v29, %v1902_v32  ;;  %v2425_v29 = vld [vmem:[#allocation5 + $0x188] sm:$0xff] }
 0x164   :  { %3654 = vmatprep.subr.bf16.mxu1 %v4567_v21  ;;  %v4617_v31 = vcombine.high %v2425_v29, %v2437_v30  ;;  %v4616_v33 = vcombine.low %v2425_v29, %v2437_v30  ;;  %v2557_v18 = vld [vmem:[#allocation5 + $0x5a8] sm:$0xff] }
 0x17d   :  { %v4930_v35 = vpop.f32.mrb[12].mxu0 }
 0x17e   :  { %v4952_v36 = vpop.f32.mrb[12].mxu1  ;;  %v4931_v37 = vpop.f32.mrb[13].mxu0 }
 0x17f   :  { %v4932_v38 = vadd.f32 %v4931_v37, %v4930_v35  ;;  %v4953_v39 = vpop.f32.mrb[13].mxu1  ;;  %v4933_v40 = vpop.f32.mrb[14].mxu0  ;;  %v2461_v35 = vld [vmem:[#allocation5 + $0x2a8] sm:$0xff] }
 0x180   :  { %v4954_v41 = vadd.f32 %v4953_v39, %v4952_v36  ;;  %v4955_v42 = vpop.f32.mrb[14].mxu1  ;;  %v4934_v43 = vpop.f32.mrb[15].mxu0  ;;  %v2485_v39 = vld [vmem:[#allocation5 + $0x368] sm:$0xff] }
 0x181   :  { %v1982_v44 = vadd.f32 %v4932_v38, %v1942_v34  ;;  %v4956_v45 = vpop.f32.mrb[15].mxu1  ;;  %v2449_v34 = vld [vmem:[#allocation5 + $0x248] sm:$0xff] }
 0x182   :  { %v4641_v36 = vcombine.high %v2449_v34, %v2461_v35  ;;  %v4640_v37 = vcombine.low %v2449_v34, %v2461_v35  ;;  %v2473_v38 = vld [vmem:[#allocation5 + $0x308] sm:$0xff]  ;;  %v2402_v35 = vld [vmem:[#allocation5 + $0xd0] sm:$0xff] }
 0x183   :  { %v2022_v46 = vadd.f32 %v4954_v41, %v1982_v44  ;;  %v4665_v40 = vcombine.high %v2473_v38, %v2485_v39  ;;  %v4664_v41 = vcombine.low %v2473_v38, %v2485_v39  ;;  %v2497_v42 = vld [vmem:[#allocation5 + $0x3c8] sm:$0xff]  ;;  %v2415_v38 = vld [vmem:[#allocation5 + $0x138] sm:$0xff] }
 0x184   :  { %v2509_v43 = vld [vmem:[#allocation5 + $0x428] sm:$0xff] }
 0x185   :  { %v4689_v44 = vcombine.high %v2497_v42, %v2509_v43  ;;  %v4688_v45 = vcombine.low %v2497_v42, %v2509_v43  ;;  %v2426_v43 = vld [vmem:[#allocation5 + $0x190] sm:$0xff] }
 0x19d   :  { %v4974_v47 = vpop.f32.mrb[16].mxu0 }
 0x19e   :  { %v4996_v48 = vpop.f32.mrb[16].mxu1  ;;  %v4975_v49 = vpop.f32.mrb[17].mxu0 }
 0x19f   :  { %v4997_v50 = vpop.f32.mrb[17].mxu1  ;;  %v4976_v51 = vadd.f32 %v4975_v49, %v4974_v47  ;;  %v4977_v53 = vpop.f32.mrb[18].mxu0  ;;  %v2533_v47 = vld [vmem:[#allocation5 + $0x4e8] sm:$0xff] }
 0x1a0   :  { %v4998_v52 = vadd.f32 %v4997_v50, %v4996_v48  ;;  %v4999_v54 = vpop.f32.mrb[18].mxu1  ;;  %v4978_v55 = vpop.f32.mrb[19].mxu0  ;;  %v2281_v50 = vld [vmem:[%s5887_s1] sm:$0xff] }
 0x1a1   :  { %v5000_v56 = vpop.f32.mrb[19].mxu1  ;;  %v2062_v57 = vadd.f32 %v4976_v51, %v2022_v46  ;;  %v2521_v46 = vld [vmem:[#allocation5 + $0x488] sm:$0xff]  ;;  %v2412_v53 = vld [vmem:[#allocation5 + $0x120] sm:$0xff] }
 0x1a2   :  { %v4713_v48 = vcombine.high %v2521_v46, %v2533_v47  ;;  %v4712_v49 = vcombine.low %v2521_v46, %v2533_v47  ;;  %v2439_v46 = vld [vmem:[#allocation5 + $0x1f8] sm:$0xff] }
 0x1a3   :  { %v2102_v58 = vadd.f32 %v4998_v52, %v2062_v57  ;;  %v2400_v52 = vld [vmem:[#allocation5 + $0xc0] sm:$0xff] }
 0x1a4   :  { %v4591_v56 = vcombine.high %v2400_v52, %v2412_v53  ;;  %v2424_v57 = vld [vmem:[#allocation5 + $0x180] sm:$0xff] }
 0x1bd   :  { %v5018_v59 = vpop.f32.mrb[20].mxu0 }
 0x1be   :  { %v5040_v60 = vpop.f32.mrb[20].mxu1  ;;  %v5019_v61 = vpop.f32.mrb[21].mxu0 }
 0x1bf   :  { %v5020_v62 = vadd.f32 %v5019_v61, %v5018_v59  ;;  %v5041_v63 = vpop.f32.mrb[21].mxu1  ;;  %v5021_v0 = vpop.f32.mrb[22].mxu0  ;;  %v4590_v59 = vcombine.low %v2400_v52, %v2412_v53  ;;  %v2448_v61 = vld [vmem:[#allocation5 + $0x240] sm:$0xff]  ;;  %v2462_v52 = vld [vmem:[#allocation5 + $0x2b0] sm:$0xff]  ;;  %v2451_v53 = vld [vmem:[#allocation5 + $0x258] sm:$0xff] }
 0x1c0   :  { %v5042_v1 = vadd.f32 %v5041_v63, %v5040_v60  ;;  %v5043_v2 = vpop.f32.mrb[22].mxu1  ;;  %v5022_v3 = vpop.f32.mrb[23].mxu0 }
 0x1c1   :  { %v2142_v4 = vadd.f32 %v5020_v62, %v2102_v58  ;;  %v5044_v5 = vpop.f32.mrb[23].mxu1  ;;  %v2436_v58 = vld [vmem:[#allocation5 + $0x1e0] sm:$0xff] }
 0x1c2   :  { %v4615_v60 = vcombine.high %v2424_v57, %v2436_v58  ;;  %v2460_v62 = vld [vmem:[#allocation5 + $0x2a0] sm:$0xff]  ;;  %v4614_v63 = vcombine.low %v2424_v57, %v2436_v58 }
 0x1c3   :  { %v2182_v6 = vadd.f32 %v5042_v1, %v2142_v4  ;;  %v4639_v0 = vcombine.high %v2448_v61, %v2460_v62  ;;  %v2472_v1 = vld [vmem:[#allocation5 + $0x300] sm:$0xff]  ;;  %v4638_v3 = vcombine.low %v2448_v61, %v2460_v62  ;;  %v2475_v61 = vld [vmem:[#allocation5 + $0x318] sm:$0xff] }
 0x1c4   :  { %v2484_v2 = vld [vmem:[#allocation5 + $0x360] sm:$0xff]  ;;  %v2487_v62 = vld [vmem:[#allocation5 + $0x378] sm:$0xff] }
 0x1c5   :  { %v2187_v7 = vmax.f32 %v2182_v6, 0.0  ;;  %v4663_v4 = vcombine.high %v2472_v1, %v2484_v2  ;;  %v2496_v5 = vld [vmem:[#allocation5 + $0x3c0] sm:$0xff] }
 0x1c6   :  { %v2508_v6 = vld [vmem:[#allocation5 + $0x420] sm:$0xff] }
 0x1c7   :  { %5099 = vmatmul.mubr.f32.vlgmr.msra.gmra.mrb[24].mxu0 %v2187_v7  ;;  %v4662_v7 = vcombine.low %v2472_v1, %v2484_v2  ;;  %v4687_v8 = vcombine.high %v2496_v5, %v2508_v6  ;;  %v4669_v2 = vcombine.high %v2475_v61, %v2487_v62 }
 0x1c8   :  { %3696 = vmatpush1.bf16.msra.mxu0 %v4568_v23  ;;  %v2390_v23 = vld [vmem:[#allocation5 + $0x70] sm:$0xff] }
 0x1c9   :  { %3697 = vmatprep.subr.bf16.mxu0 %v4593_v27  ;;  %v4570_v25 = vcombine.low %v2378_v22, %v2390_v23  ;;  %v4571_v26 = vcombine.high %v2378_v22, %v2390_v23  ;;  %v2391_v27 = vld [vmem:[#allocation5 + $0x78] sm:$0xff] }
 0x1ca   :  { %v4572_v29 = vcombine.low %v2379_v24, %v2391_v27  ;;  %v4573_v30 = vcombine.high %v2379_v24, %v2391_v27  ;;  %v2559_v22 = vld [vmem:[#allocation5 + $0x5b8] sm:$0xff]  ;;  %v2380_v27 = vld [vmem:[#allocation5 + $0x20] sm:$0xff] }
 0x1cc   :  { %3698 = vmatpush1.bf16.msra.mxu0 %v4592_v28  ;;  %v5568_v28 = vmov 0  }
 0x1cd   :  { %3699 = vmatprep.subr.bf16.mxu0 %v4617_v31  ;;  %3727 = vmatprep.mubr.bf16.mxu0 %v5568_v28  ;;  %v4564_v31 = vld [vmem:[%s5893_s7] ss:$0 sm:$0xff] }
 0x1d0   :  { %3700 = vmatpush1.bf16.msra.mxu0 %v4616_v33 }
 0x1d1   :  { %3701 = vmatprep.subr.bf16.mxu0 %v4641_v36  ;;  %v2414_v36 = vld [vmem:[#allocation5 + $0x130] sm:$0xff] }
 0x1d2   :  { %v4594_v47 = vcombine.low %v2402_v35, %v2414_v36 }
 0x1d4   :  { %3702 = vmatpush1.bf16.msra.mxu0 %v4640_v37  ;;  %v2403_v37 = vld [vmem:[#allocation5 + $0xd8] sm:$0xff] }
 0x1d5   :  { %3703 = vmatprep.subr.bf16.mxu0 %v4665_v40  ;;  %v4597_v42 = vcombine.high %v2403_v37, %v2415_v38 }
 0x1d8   :  { %3704 = vmatpush1.bf16.msra.mxu0 %v4664_v41  ;;  %v4595_v41 = vcombine.high %v2402_v35, %v2414_v36  ;;  %v2404_v36 = vld [vmem:[#allocation5 + $0xe0] sm:$0xff] }
 0x1d9   :  { %3705 = vmatprep.subr.bf16.mxu0 %v4689_v44  ;;  %v2438_v44 = vld [vmem:[#allocation5 + $0x1f0] sm:$0xff] }
 0x1dc   :  { %3706 = vmatpush1.bf16.msra.mxu0 %v4688_v45  ;;  %v2427_v45 = vld [vmem:[#allocation5 + $0x198] sm:$0xff] }
 0x1dd   :  { %3707 = vmatprep.subr.bf16.mxu0 %v4713_v48  ;;  %v4596_v48 = vcombine.low %v2403_v37, %v2415_v38  ;;  %v2416_v37 = vld [vmem:[#allocation5 + $0x140] sm:$0xff]  ;;  %v2405_v38 = vld [vmem:[#allocation5 + $0xe8] sm:$0xff] }
 0x1e0   :  { %3708 = vmatpush1.bf16.msra.mxu0 %v4712_v49  ;;  %v4619_v49 = vcombine.high %v2426_v43, %v2438_v44 }
 0x29a   :  { %v2277_v12 = vpop.f32.mrb[24].mxu0 }
 0x29b   :  { %v2278_v13 = vadd.f32 %v4563_v11, %v2277_v12  ;;  %v5100_v14 = vpop.f32.mrb[25].mxu0  ;;  %v4686_v11 = vcombine.low %v2496_v5, %v2508_v6  ;;  %v4711_v12 = vcombine.high %v2520_v9, %v2532_v10  ;;  %v2499_v5 = vld [vmem:[#allocation5 + $0x3d8] sm:$0xff] }
 0x29c   :  { %v2544_v14 = vld [vmem:[#allocation5 + $0x540] sm:$0xff]  ;;  %v2511_v6 = vld [vmem:[#allocation5 + $0x438] sm:$0xff] }
 0x29d   :  { %v2282_v15 = vmul.f32 0.5, %v2278_v13  ;;  %4315 = vst.msk [vmem:[#allocation8] sm:$0xff] %vm4314_vm1, %v2278_v13 }
 0x29f   :  { %v2283_v16 = vmul.f32 1.442695, %v2282_v15  ;;  %v2556_v15 = vld [vmem:[#allocation5 + $0x5a0] sm:$0xff] }
 0x2a0   :  { %v4735_v17 = vcombine.high %v2544_v14, %v2556_v15  ;;  %v4734_v19 = vcombine.low %v2544_v14, %v2556_v15  ;;  %v2535_v14 = vld [vmem:[#allocation5 + $0x4f8] sm:$0xff] }
 0x2a1   :  { %5364 = vpow2.f32 %v2283_v16  ;;  %v2545_v16 = vld [vmem:[#allocation5 + $0x548] sm:$0xff] }
 0x2a2   :  { %v4737_v21 = vcombine.high %v2545_v16, %v2557_v18 }
 0x2a4   :  { %3709 = vmatprep.subr.bf16.mxu0 %v4737_v21  ;;  %v2547_v21 = vld [vmem:[#allocation5 + $0x558] sm:$0xff] }
 0x2ab   :  { %v5365_v32 = vpop.eup %5364 }
 0x2ac   :  { %2286 = vrot.lane.b32.xlu0 %v5365_v32, %s5567_s5 }
 0x31e   :  { %v2287_v51 = vpop.permute.xlu0 %2286 }
 0x31f   :  { %v2289_v54 = vmul.f32 %v2287_v51, %v2281_v50  ;;  %v4621_v50 = vcombine.high %v2427_v45, %v2439_v46  ;;  %v2450_v51 = vld [vmem:[#allocation5 + $0x250] sm:$0xff] }
 0x320   :  { %v4643_v57 = vcombine.high %v2450_v51, %v2462_v52 }
 0x321   :  { %v2290_v55 = vadd.f32 %v2289_v54, %v2278_v13  ;;  %v4710_v13 = vcombine.low %v2520_v9, %v2532_v10  ;;  %v2463_v54 = vld [vmem:[#allocation5 + $0x2b8] sm:$0xff]  ;;  %v4693_v10 = vcombine.high %v2499_v5, %v2511_v6 }
 0x322   :  { %v4645_v58 = vcombine.high %v2451_v53, %v2463_v54 }
 0x323   :  { %5106 = vmatmul.mubr.msk.f32.vlgmr.msra.gmra.mrb[24].mxu1 %vm2300_vm2, %v2290_v55  ;;  %v4618_v55 = vcombine.low %v2426_v43, %v2438_v44  ;;  %v4599_v43 = vcombine.high %v2404_v36, %v2416_v37 }
 0x324   :  { %3655 = vmatpush1.bf16.msra.mxu1 %v4566_v20  ;;  %v4736_v20 = vcombine.low %v2545_v16, %v2557_v18  ;;  %3686 = vmatprep.mubr.bf16.mxu1 %v5568_v28  ;;  %v4692_v16 = vcombine.low %v2499_v5, %v2511_v6  ;;  %v2500_v5 = vld [vmem:[#allocation5 + $0x3e0] sm:$0xff] }
 0x325   :  { %3656 = vmatprep.subr.bf16.mxu1 %v4591_v56  ;;  %v4620_v56 = vcombine.low %v2427_v45, %v2439_v46  ;;  %v2428_v45 = vld [vmem:[#allocation5 + $0x1a0] sm:$0xff] }
 0x326   :  { %3710 = vmatpush1.bf16.msra.mxu0 %v4736_v20  ;;  %v2558_v20 = vld [vmem:[#allocation5 + $0x5b0] sm:$0xff]  ;;  %v2440_v46 = vld [vmem:[#allocation5 + $0x200] sm:$0xff] }
 0x327   :  { %3777 = vmatprep.subr.bf16.mxu0 %v4573_v30  ;;  %v2381_v30 = vld [vmem:[#allocation5 + $0x28] sm:$0xff]  ;;  %v2512_v6 = vld [vmem:[#allocation5 + $0x440] sm:$0xff] }
 0x328   :  { %3657 = vmatpush1.bf16.msra.mxu1 %v4590_v59  ;;  %v2474_v59 = vld [vmem:[#allocation5 + $0x310] sm:$0xff] }
 0x329   :  { %3658 = vmatprep.subr.bf16.mxu1 %v4615_v60  ;;  %v2486_v60 = vld [vmem:[#allocation5 + $0x370] sm:$0xff] }
 0x32a   :  { %v4667_v1 = vcombine.high %v2474_v59, %v2486_v60 }
 0x32c   :  { %3659 = vmatpush1.bf16.msra.mxu1 %v4614_v63  ;;  %v4642_v63 = vcombine.low %v2450_v51, %v2462_v52  ;;  %v4623_v51 = vcombine.high %v2428_v45, %v2440_v46 }
 0x32d   :  { %3660 = vmatprep.subr.bf16.mxu1 %v4639_v0  ;;  %v4644_v0 = vcombine.low %v2451_v53, %v2463_v54  ;;  %v2452_v53 = vld [vmem:[#allocation5 + $0x260] sm:$0xff] }
 0x32e   :  { %v2464_v54 = vld [vmem:[#allocation5 + $0x2c0] sm:$0xff] }
 0x330   :  { %3661 = vmatpush1.bf16.msra.mxu1 %v4638_v3  ;;  %v2498_v3 = vld [vmem:[#allocation5 + $0x3d0] sm:$0xff] }
 0x331   :  { %3662 = vmatprep.subr.bf16.mxu1 %v4663_v4  ;;  %v2510_v4 = vld [vmem:[#allocation5 + $0x430] sm:$0xff] }
 0x332   :  { %v4691_v9 = vcombine.high %v2498_v3, %v2510_v4  ;;  %v4690_v15 = vcombine.low %v2498_v3, %v2510_v4 }
 0x334   :  { %3663 = vmatpush1.bf16.msra.mxu1 %v4662_v7  ;;  %v4666_v7 = vcombine.low %v2474_v59, %v2486_v60  ;;  %v4647_v59 = vcombine.high %v2452_v53, %v2464_v54 }
 0x335   :  { %3664 = vmatprep.subr.bf16.mxu1 %v4687_v8  ;;  %v4668_v8 = vcombine.low %v2475_v61, %v2487_v62  ;;  %v2476_v61 = vld [vmem:[#allocation5 + $0x320] sm:$0xff] }
 0x336   :  { %v2488_v62 = vld [vmem:[#allocation5 + $0x380] sm:$0xff] }
 0x337   :  { %v4671_v3 = vcombine.high %v2476_v61, %v2488_v62 }
 0x338   :  { %3665 = vmatpush1.bf16.msra.mxu1 %v4686_v11  ;;  %v2522_v11 = vld [vmem:[#allocation5 + $0x490] sm:$0xff] }
 0x339   :  { %3666 = vmatprep.subr.bf16.mxu1 %v4711_v12  ;;  %v2534_v12 = vld [vmem:[#allocation5 + $0x4f0] sm:$0xff] }
 0x33a   :  { %v4714_v23 = vcombine.low %v2522_v11, %v2534_v12 }
 0x33c   :  { %3667 = vmatpush1.bf16.msra.mxu1 %v4710_v13  ;;  %v2523_v13 = vld [vmem:[#allocation5 + $0x498] sm:$0xff] }
 0x33d   :  { %3668 = vmatprep.subr.bf16.mxu1 %v4735_v17  ;;  %v4715_v17 = vcombine.high %v2522_v11, %v2534_v12  ;;  %v4717_v18 = vcombine.high %v2523_v13, %v2535_v14  ;;  %v4716_v24 = vcombine.low %v2523_v13, %v2535_v14  ;;  %v4695_v11 = vcombine.high %v2500_v5, %v2512_v6  ;;  %v2524_v13 = vld [vmem:[#allocation5 + $0x4a0] sm:$0xff] }
 0x33e   :  { %v2536_v14 = vld [vmem:[#allocation5 + $0x500] sm:$0xff] }
 0x340   :  { %3669 = vmatpush1.bf16.msra.mxu1 %v4734_v19  ;;  %v2546_v19 = vld [vmem:[#allocation5 + $0x550] sm:$0xff] }
 0x341   :  { %3736 = vmatprep.subr.bf16.mxu1 %v4571_v26  ;;  %v4741_v26 = vcombine.high %v2547_v21, %v2559_v22 }
 0x3f6   :  { %v2370_v32 = vpop.f32.mrb[24].mxu1 }
 0x3f7   :  { %v2371_v33 = vadd.f32 %v4564_v31, %v2370_v32  ;;  %v5107_v34 = vpop.f32.mrb[25].mxu1  ;;  %v2393_v31 = vld [vmem:[#allocation5 + $0x88] sm:$0xff]  ;;  %v4738_v32 = vcombine.low %v2546_v19, %v2558_v20 }
 0x3f8   :  { %v4577_v35 = vcombine.high %v2381_v30, %v2393_v31 }
 0x3f9   :  { %v2374_v39 = vmax.f32 %v2371_v33, 0.0  ;;  %v4740_v33 = vcombine.low %v2547_v21, %v2559_v22  ;;  %v2548_v21 = vld [vmem:[#allocation5 + $0x560] sm:$0xff] }
 0x3fa   :  { %v2560_v22 = vld [vmem:[#allocation5 + $0x5c0] sm:$0xff] }
 0x3fb   :  { %v5759_v40 = vpack.c.bf16 %v2374_v39, %v2374_v39  ;;  %v2417_v39 = vld [vmem:[#allocation5 + $0x148] sm:$0xff] }
 0x3fc   :  { %v4601_v44 = vcombine.high %v2405_v38, %v2417_v39 }
 0x3fd   :  { %3687 = vmatmul.mubr.bf16.vlgmr.msra.gmra.mrb[28].mxu1 %v5759_v40  ;;  %3728 = vmatmul.mubr.bf16.vlgmr.msra.gmra.mrb[28].mxu0 %v5759_v40 }
 0x3fe   :  { %3737 = vmatpush1.bf16.msra.mxu1 %v4570_v25  ;;  %3778 = vmatpush1.bf16.msra.mxu0 %v4572_v29  ;;  %v4739_v25 = vcombine.high %v2546_v19, %v2558_v20  ;;  %v2392_v29 = vld [vmem:[#allocation5 + $0x80] sm:$0xff]  ;;  %v4719_v19 = vcombine.high %v2524_v13, %v2536_v14 }
 0x3ff   :  { %3738 = vmatprep.subr.bf16.mxu1 %v4595_v41  ;;  %3779 = vmatprep.subr.bf16.mxu0 %v4597_v42  ;;  %v4575_v34 = vcombine.high %v2380_v27, %v2392_v29  ;;  %v4574_v41 = vcombine.low %v2380_v27, %v2392_v29  ;;  %v4576_v42 = vcombine.low %v2381_v30, %v2393_v31  ;;  %v2382_v30 = vld [vmem:[#allocation5 + $0x30] sm:$0xff] }
 0x400   :  { %3768 = vmatprep.mubr.bf16.mxu1 %v5568_v28  ;;  %3809 = vmatprep.mubr.bf16.mxu0 %v5568_v28  ;;  %v4743_v27 = vcombine.high %v2548_v21, %v2560_v22  ;;  %v2394_v31 = vld [vmem:[#allocation5 + $0x90] sm:$0xff] }
 0x402   :  { %3739 = vmatpush1.bf16.msra.mxu1 %v4594_v47  ;;  %3780 = vmatpush1.bf16.msra.mxu0 %v4596_v48  ;;  %v2429_v47 = vld [vmem:[#allocation5 + $0x1a8] sm:$0xff] }
 0x403   :  { %3740 = vmatprep.subr.bf16.mxu1 %v4619_v49  ;;  %3781 = vmatprep.subr.bf16.mxu0 %v4621_v50  ;;  %v2441_v48 = vld [vmem:[#allocation5 + $0x208] sm:$0xff]  ;;  %v4598_v49 = vcombine.low %v2404_v36, %v2416_v37  ;;  %v4600_v50 = vcombine.low %v2405_v38, %v2417_v39  ;;  %v4579_v36 = vcombine.high %v2382_v30, %v2394_v31  ;;  %v2406_v38 = vld [vmem:[#allocation5 + $0xf0] sm:$0xff] }
 0x404   :  { %v4625_v52 = vcombine.high %v2429_v47, %v2441_v48  ;;  %v2418_v39 = vld [vmem:[#allocation5 + $0x150] sm:$0xff] }
 0x406   :  { %3741 = vmatpush1.bf16.msra.mxu1 %v4618_v55  ;;  %3782 = vmatpush1.bf16.msra.mxu0 %v4620_v56  ;;  %v2453_v55 = vld [vmem:[#allocation5 + $0x268] sm:$0xff] }
 0x407   :  { %3742 = vmatprep.subr.bf16.mxu1 %v4643_v57  ;;  %3783 = vmatprep.subr.bf16.mxu0 %v4645_v58  ;;  %v2465_v56 = vld [vmem:[#allocation5 + $0x2c8] sm:$0xff]  ;;  %v4622_v57 = vcombine.low %v2428_v45, %v2440_v46  ;;  %v4624_v58 = vcombine.low %v2429_v47, %v2441_v48  ;;  %v4603_v45 = vcombine.high %v2406_v38, %v2418_v39  ;;  %v2430_v47 = vld [vmem:[#allocation5 + $0x1b0] sm:$0xff] }
 0x408   :  { %v4649_v60 = vcombine.high %v2453_v55, %v2465_v56  ;;  %v2442_v48 = vld [vmem:[#allocation5 + $0x210] sm:$0xff] }
 0x40a   :  { %3743 = vmatpush1.bf16.msra.mxu1 %v4642_v63  ;;  %3784 = vmatpush1.bf16.msra.mxu0 %v4644_v0  ;;  %v2477_v63 = vld [vmem:[#allocation5 + $0x328] sm:$0xff] }
 0x40b   :  { %3744 = vmatprep.subr.bf16.mxu1 %v4667_v1  ;;  %3785 = vmatprep.subr.bf16.mxu0 %v4669_v2  ;;  %v2489_v0 = vld [vmem:[#allocation5 + $0x388] sm:$0xff]  ;;  %v4646_v1 = vcombine.low %v2452_v53, %v2464_v54  ;;  %v4648_v2 = vcombine.low %v2453_v55, %v2465_v56  ;;  %v4627_v53 = vcombine.high %v2430_v47, %v2442_v48  ;;  %v2454_v55 = vld [vmem:[#allocation5 + $0x270] sm:$0xff] }
 0x40c   :  { %v4673_v4 = vcombine.high %v2477_v63, %v2489_v0  ;;  %v2466_v56 = vld [vmem:[#allocation5 + $0x2d0] sm:$0xff] }
 0x40e   :  { %3745 = vmatpush1.bf16.msra.mxu1 %v4666_v7  ;;  %3786 = vmatpush1.bf16.msra.mxu0 %v4668_v8  ;;  %v2501_v7 = vld [vmem:[#allocation5 + $0x3e8] sm:$0xff] }
 0x40f   :  { %3746 = vmatprep.subr.bf16.mxu1 %v4691_v9  ;;  %3787 = vmatprep.subr.bf16.mxu0 %v4693_v10  ;;  %v2513_v8 = vld [vmem:[#allocation5 + $0x448] sm:$0xff]  ;;  %v4670_v9 = vcombine.low %v2476_v61, %v2488_v62  ;;  %v4672_v10 = vcombine.low %v2477_v63, %v2489_v0  ;;  %v4651_v61 = vcombine.high %v2454_v55, %v2466_v56  ;;  %v2478_v63 = vld [vmem:[#allocation5 + $0x330] sm:$0xff] }
 0x410   :  { %v4697_v12 = vcombine.high %v2501_v7, %v2513_v8  ;;  %v2490_v0 = vld [vmem:[#allocation5 + $0x390] sm:$0xff] }
 0x412   :  { %3747 = vmatpush1.bf16.msra.mxu1 %v4690_v15  ;;  %3788 = vmatpush1.bf16.msra.mxu0 %v4692_v16  ;;  %v2525_v15 = vld [vmem:[#allocation5 + $0x4a8] sm:$0xff] }
 0x413   :  { %3748 = vmatprep.subr.bf16.mxu1 %v4715_v17  ;;  %3789 = vmatprep.subr.bf16.mxu0 %v4717_v18  ;;  %v2537_v16 = vld [vmem:[#allocation5 + $0x508] sm:$0xff]  ;;  %v4694_v17 = vcombine.low %v2500_v5, %v2512_v6  ;;  %v4696_v18 = vcombine.low %v2501_v7, %v2513_v8  ;;  %v4675_v5 = vcombine.high %v2478_v63, %v2490_v0  ;;  %v2502_v7 = vld [vmem:[#allocation5 + $0x3f0] sm:$0xff] }
 0x414   :  { %v4721_v20 = vcombine.high %v2525_v15, %v2537_v16  ;;  %v2514_v8 = vld [vmem:[#allocation5 + $0x450] sm:$0xff] }
 0x416   :  { %3749 = vmatpush1.bf16.msra.mxu1 %v4714_v23  ;;  %3790 = vmatpush1.bf16.msra.mxu0 %v4716_v24  ;;  %v2549_v23 = vld [vmem:[#allocation5 + $0x568] sm:$0xff] }
 0x417   :  { %3750 = vmatprep.subr.bf16.mxu1 %v4739_v25  ;;  %3791 = vmatprep.subr.bf16.mxu0 %v4741_v26  ;;  %v2561_v24 = vld [vmem:[#allocation5 + $0x5c8] sm:$0xff]  ;;  %v4718_v25 = vcombine.low %v2524_v13, %v2536_v14  ;;  %v4720_v26 = vcombine.low %v2525_v15, %v2537_v16  ;;  %v4699_v13 = vcombine.high %v2502_v7, %v2514_v8  ;;  %v2526_v15 = vld [vmem:[#allocation5 + $0x4b0] sm:$0xff] }
 0x418   :  { %v4745_v29 = vcombine.high %v2549_v23, %v2561_v24  ;;  %v2538_v16 = vld [vmem:[#allocation5 + $0x510] sm:$0xff] }
 0x41a   :  { %3751 = vmatpush1.bf16.msra.mxu1 %v4738_v32  ;;  %3792 = vmatpush1.bf16.msra.mxu0 %v4740_v33  ;;  %v2383_v32 = vld [vmem:[#allocation5 + $0x38] sm:$0xff] }
 0x41b   :  { %3818 = vmatprep.subr.bf16.mxu1 %v4575_v34  ;;  %3859 = vmatprep.subr.bf16.mxu0 %v4577_v35  ;;  %v2395_v33 = vld [vmem:[#allocation5 + $0x98] sm:$0xff]  ;;  %v4742_v34 = vcombine.low %v2548_v21, %v2560_v22  ;;  %v4744_v35 = vcombine.low %v2549_v23, %v2561_v24  ;;  %v4723_v21 = vcombine.high %v2526_v15, %v2538_v16  ;;  %v2550_v23 = vld [vmem:[#allocation5 + $0x570] sm:$0xff] }
 0x41c   :  { %v4581_v37 = vcombine.high %v2383_v32, %v2395_v33  ;;  %v2562_v24 = vld [vmem:[#allocation5 + $0x5d0] sm:$0xff] }
 0x41d   :  { %3769 = vmatmul.mubr.bf16.vlgmr.msra.gmra.mrb[32].mxu1 %v5759_v40  ;;  %3810 = vmatmul.mubr.bf16.vlgmr.msra.gmra.mrb[32].mxu0 %v5759_v40 }
 0x41e   :  { %3819 = vmatpush1.bf16.msra.mxu1 %v4574_v41  ;;  %3860 = vmatpush1.bf16.msra.mxu0 %v4576_v42  ;;  %v2407_v41 = vld [vmem:[#allocation5 + $0xf8] sm:$0xff] }
 0x41f   :  { %3820 = vmatprep.subr.bf16.mxu1 %v4599_v43  ;;  %3861 = vmatprep.subr.bf16.mxu0 %v4601_v44  ;;  %v2419_v42 = vld [vmem:[#allocation5 + $0x158] sm:$0xff]  ;;  %v4578_v43 = vcombine.low %v2382_v30, %v2394_v31  ;;  %v4580_v44 = vcombine.low %v2383_v32, %v2395_v33  ;;  %v4747_v30 = vcombine.high %v2550_v23, %v2562_v24  ;;  %v2384_v32 = vld [vmem:[#allocation5 + $0x40] sm:$0xff] }
 0x420   :  { %3850 = vmatprep.mubr.bf16.mxu1 %v5568_v28  ;;  %3891 = vmatprep.mubr.bf16.mxu0 %v5568_v28  ;;  %v4605_v46 = vcombine.high %v2407_v41, %v2419_v42  ;;  %v2396_v33 = vld [vmem:[#allocation5 + $0xa0] sm:$0xff] }
 0x422   :  { %3821 = vmatpush1.bf16.msra.mxu1 %v4598_v49  ;;  %3862 = vmatpush1.bf16.msra.mxu0 %v4600_v50  ;;  %v2431_v49 = vld [vmem:[#allocation5 + $0x1b8] sm:$0xff] }
 0x423   :  { %3822 = vmatprep.subr.bf16.mxu1 %v4623_v51  ;;  %3863 = vmatprep.subr.bf16.mxu0 %v4625_v52  ;;  %v2443_v50 = vld [vmem:[#allocation5 + $0x218] sm:$0xff]  ;;  %v4602_v51 = vcombine.low %v2406_v38, %v2418_v39  ;;  %v4604_v52 = vcombine.low %v2407_v41, %v2419_v42  ;;  %v4583_v38 = vcombine.high %v2384_v32, %v2396_v33  ;;  %v2408_v41 = vld [vmem:[#allocation5 + $0x100] sm:$0xff] }
 0x424   :  { %v4629_v54 = vcombine.high %v2431_v49, %v2443_v50  ;;  %v2420_v42 = vld [vmem:[#allocation5 + $0x160] sm:$0xff] }
 0x426   :  { %3823 = vmatpush1.bf16.msra.mxu1 %v4622_v57  ;;  %3864 = vmatpush1.bf16.msra.mxu0 %v4624_v58  ;;  %v2455_v57 = vld [vmem:[#allocation5 + $0x278] sm:$0xff] }
 0x427   :  { %3824 = vmatprep.subr.bf16.mxu1 %v4647_v59  ;;  %3865 = vmatprep.subr.bf16.mxu0 %v4649_v60  ;;  %v2467_v58 = vld [vmem:[#allocation5 + $0x2d8] sm:$0xff]  ;;  %v4626_v59 = vcombine.low %v2430_v47, %v2442_v48  ;;  %v4628_v60 = vcombine.low %v2431_v49, %v2443_v50  ;;  %v4607_v47 = vcombine.high %v2408_v41, %v2420_v42  ;;  %v2432_v49 = vld [vmem:[#allocation5 + $0x1c0] sm:$0xff] }
 0x428   :  { %v4653_v62 = vcombine.high %v2455_v57, %v2467_v58  ;;  %v2444_v50 = vld [vmem:[#allocation5 + $0x220] sm:$0xff] }
 0x42a   :  { %3825 = vmatpush1.bf16.msra.mxu1 %v4646_v1  ;;  %3866 = vmatpush1.bf16.msra.mxu0 %v4648_v2  ;;  %v2479_v1 = vld [vmem:[#allocation5 + $0x338] sm:$0xff] }
 0x42b   :  { %3826 = vmatprep.subr.bf16.mxu1 %v4671_v3  ;;  %3867 = vmatprep.subr.bf16.mxu0 %v4673_v4  ;;  %v2491_v2 = vld [vmem:[#allocation5 + $0x398] sm:$0xff]  ;;  %v4650_v3 = vcombine.low %v2454_v55, %v2466_v56  ;;  %v4652_v4 = vcombine.low %v2455_v57, %v2467_v58  ;;  %v4631_v55 = vcombine.high %v2432_v49, %v2444_v50  ;;  %v2456_v57 = vld [vmem:[#allocation5 + $0x280] sm:$0xff] }
 0x42c   :  { %v4677_v6 = vcombine.high %v2479_v1, %v2491_v2  ;;  %v2468_v58 = vld [vmem:[#allocation5 + $0x2e0] sm:$0xff] }
 0x42e   :  { %3827 = vmatpush1.bf16.msra.mxu1 %v4670_v9  ;;  %3868 = vmatpush1.bf16.msra.mxu0 %v4672_v10  ;;  %v2503_v9 = vld [vmem:[#allocation5 + $0x3f8] sm:$0xff] }
 0x42f   :  { %3828 = vmatprep.subr.bf16.mxu1 %v4695_v11  ;;  %3869 = vmatprep.subr.bf16.mxu0 %v4697_v12  ;;  %v2515_v10 = vld [vmem:[#allocation5 + $0x458] sm:$0xff]  ;;  %v4674_v11 = vcombine.low %v2478_v63, %v2490_v0  ;;  %v4676_v12 = vcombine.low %v2479_v1, %v2491_v2  ;;  %v4655_v63 = vcombine.high %v2456_v57, %v2468_v58  ;;  %v2480_v1 = vld [vmem:[#allocation5 + $0x340] sm:$0xff] }
 0x430   :  { %v4701_v14 = vcombine.high %v2503_v9, %v2515_v10  ;;  %v2492_v2 = vld [vmem:[#allocation5 + $0x3a0] sm:$0xff] }
 0x432   :  { %3829 = vmatpush1.bf16.msra.mxu1 %v4694_v17  ;;  %3870 = vmatpush1.bf16.msra.mxu0 %v4696_v18  ;;  %v2527_v17 = vld [vmem:[#allocation5 + $0x4b8] sm:$0xff] }
 0x433   :  { %3830 = vmatprep.subr.bf16.mxu1 %v4719_v19  ;;  %3871 = vmatprep.subr.bf16.mxu0 %v4721_v20  ;;  %v2539_v18 = vld [vmem:[#allocation5 + $0x518] sm:$0xff]  ;;  %v4698_v19 = vcombine.low %v2502_v7, %v2514_v8  ;;  %v4700_v20 = vcombine.low %v2503_v9, %v2515_v10  ;;  %v4679_v7 = vcombine.high %v2480_v1, %v2492_v2  ;;  %v2504_v9 = vld [vmem:[#allocation5 + $0x400] sm:$0xff] }
 0x434   :  { %v4725_v22 = vcombine.high %v2527_v17, %v2539_v18  ;;  %v2516_v10 = vld [vmem:[#allocation5 + $0x460] sm:$0xff] }
 0x436   :  { %3831 = vmatpush1.bf16.msra.mxu1 %v4718_v25  ;;  %3872 = vmatpush1.bf16.msra.mxu0 %v4720_v26  ;;  %v2551_v25 = vld [vmem:[#allocation5 + $0x578] sm:$0xff] }
 0x437   :  { %3832 = vmatprep.subr.bf16.mxu1 %v4743_v27  ;;  %3873 = vmatprep.subr.bf16.mxu0 %v4745_v29  ;;  %v2563_v26 = vld [vmem:[#allocation5 + $0x5d8] sm:$0xff]  ;;  %v4722_v27 = vcombine.low %v2526_v15, %v2538_v16  ;;  %v4724_v29 = vcombine.low %v2527_v17, %v2539_v18  ;;  %v4703_v15 = vcombine.high %v2504_v9, %v2516_v10  ;;  %v2528_v17 = vld [vmem:[#allocation5 + $0x4c0] sm:$0xff] }
 0x438   :  { %v4749_v31 = vcombine.high %v2551_v25, %v2563_v26  ;;  %v2540_v18 = vld [vmem:[#allocation5 + $0x520] sm:$0xff] }
 0x43a   :  { %3833 = vmatpush1.bf16.msra.mxu1 %v4742_v34  ;;  %3874 = vmatpush1.bf16.msra.mxu0 %v4744_v35  ;;  %v2385_v34 = vld [vmem:[#allocation5 + $0x48] sm:$0xff] }
 0x43b   :  { %3900 = vmatprep.subr.bf16.mxu1 %v4579_v36  ;;  %3941 = vmatprep.subr.bf16.mxu0 %v4581_v37  ;;  %v2397_v35 = vld [vmem:[#allocation5 + $0xa8] sm:$0xff]  ;;  %v4746_v36 = vcombine.low %v2550_v23, %v2562_v24  ;;  %v4748_v37 = vcombine.low %v2551_v25, %v2563_v26  ;;  %v4727_v23 = vcombine.high %v2528_v17, %v2540_v18  ;;  %v2552_v25 = vld [vmem:[#allocation5 + $0x580] sm:$0xff] }
 0x43c   :  { %v4585_v39 = vcombine.high %v2385_v34, %v2397_v35  ;;  %v2564_v26 = vld [vmem:[#allocation5 + $0x5e0] sm:$0xff] }
 0x43d   :  { %3851 = vmatmul.mubr.bf16.vlgmr.msra.gmra.mrb[36].mxu1 %v5759_v40  ;;  %3892 = vmatmul.mubr.bf16.vlgmr.msra.gmra.mrb[36].mxu0 %v5759_v40 }
 0x43e   :  { %3901 = vmatpush1.bf16.msra.mxu1 %v4578_v43  ;;  %3942 = vmatpush1.bf16.msra.mxu0 %v4580_v44  ;;  %v2409_v43 = vld [vmem:[#allocation5 + $0x108] sm:$0xff] }
 0x43f   :  { %3902 = vmatprep.subr.bf16.mxu1 %v4603_v45  ;;  %3943 = vmatprep.subr.bf16.mxu0 %v4605_v46  ;;  %v2421_v44 = vld [vmem:[#allocation5 + $0x168] sm:$0xff]  ;;  %v4582_v45 = vcombine.low %v2384_v32, %v2396_v33  ;;  %v4584_v46 = vcombine.low %v2385_v34, %v2397_v35  ;;  %v4751_v32 = vcombine.high %v2552_v25, %v2564_v26  ;;  %v2386_v34 = vld [vmem:[#allocation5 + $0x50] sm:$0xff] }
 0x440   :  { %3932 = vmatprep.mubr.bf16.mxu1 %v5568_v28  ;;  %3973 = vmatprep.mubr.bf16.mxu0 %v5568_v28  ;;  %v4609_v48 = vcombine.high %v2409_v43, %v2421_v44  ;;  %v2398_v35 = vld [vmem:[#allocation5 + $0xb0] sm:$0xff] }
 0x442   :  { %3903 = vmatpush1.bf16.msra.mxu1 %v4602_v51  ;;  %3944 = vmatpush1.bf16.msra.mxu0 %v4604_v52  ;;  %v2433_v51 = vld [vmem:[#allocation5 + $0x1c8] sm:$0xff] }
 0x443   :  { %3904 = vmatprep.subr.bf16.mxu1 %v4627_v53  ;;  %3945 = vmatprep.subr.bf16.mxu0 %v4629_v54  ;;  %v2445_v52 = vld [vmem:[#allocation5 + $0x228] sm:$0xff]  ;;  %v4606_v53 = vcombine.low %v2408_v41, %v2420_v42  ;;  %v4608_v54 = vcombine.low %v2409_v43, %v2421_v44  ;;  %v4587_v41 = vcombine.high %v2386_v34, %v2398_v35  ;;  %v2410_v43 = vld [vmem:[#allocation5 + $0x110] sm:$0xff] }
 0x444   :  { %v4633_v56 = vcombine.high %v2433_v51, %v2445_v52  ;;  %v2422_v44 = vld [vmem:[#allocation5 + $0x170] sm:$0xff] }
 0x446   :  { %3905 = vmatpush1.bf16.msra.mxu1 %v4626_v59  ;;  %3946 = vmatpush1.bf16.msra.mxu0 %v4628_v60  ;;  %v2457_v59 = vld [vmem:[#allocation5 + $0x288] sm:$0xff] }
 0x447   :  { %3906 = vmatprep.subr.bf16.mxu1 %v4651_v61  ;;  %3947 = vmatprep.subr.bf16.mxu0 %v4653_v62  ;;  %v2469_v60 = vld [vmem:[#allocation5 + $0x2e8] sm:$0xff]  ;;  %v4630_v61 = vcombine.low %v2432_v49, %v2444_v50  ;;  %v4632_v62 = vcombine.low %v2433_v51, %v2445_v52  ;;  %v4611_v49 = vcombine.high %v2410_v43, %v2422_v44  ;;  %v2434_v51 = vld [vmem:[#allocation5 + $0x1d0] sm:$0xff] }
 0x448   :  { %v4657_v0 = vcombine.high %v2457_v59, %v2469_v60  ;;  %v2446_v52 = vld [vmem:[#allocation5 + $0x230] sm:$0xff] }
 0x44a   :  { %3907 = vmatpush1.bf16.msra.mxu1 %v4650_v3  ;;  %3948 = vmatpush1.bf16.msra.mxu0 %v4652_v4  ;;  %v2481_v3 = vld [vmem:[#allocation5 + $0x348] sm:$0xff] }
 0x44b   :  { %3908 = vmatprep.subr.bf16.mxu1 %v4675_v5  ;;  %3949 = vmatprep.subr.bf16.mxu0 %v4677_v6  ;;  %v2493_v4 = vld [vmem:[#allocation5 + $0x3a8] sm:$0xff]  ;;  %v4654_v5 = vcombine.low %v2456_v57, %v2468_v58  ;;  %v4656_v6 = vcombine.low %v2457_v59, %v2469_v60  ;;  %v4635_v57 = vcombine.high %v2434_v51, %v2446_v52  ;;  %v2458_v59 = vld [vmem:[#allocation5 + $0x290] sm:$0xff] }
 0x44c   :  { %v4681_v8 = vcombine.high %v2481_v3, %v2493_v4  ;;  %v2470_v60 = vld [vmem:[#allocation5 + $0x2f0] sm:$0xff] }
 0x44e   :  { %3909 = vmatpush1.bf16.msra.mxu1 %v4674_v11  ;;  %3950 = vmatpush1.bf16.msra.mxu0 %v4676_v12  ;;  %v2505_v11 = vld [vmem:[#allocation5 + $0x408] sm:$0xff] }
 0x44f   :  { %3910 = vmatprep.subr.bf16.mxu1 %v4699_v13  ;;  %3951 = vmatprep.subr.bf16.mxu0 %v4701_v14  ;;  %v2517_v12 = vld [vmem:[#allocation5 + $0x468] sm:$0xff]  ;;  %v4678_v13 = vcombine.low %v2480_v1, %v2492_v2  ;;  %v4680_v14 = vcombine.low %v2481_v3, %v2493_v4  ;;  %v4659_v1 = vcombine.high %v2458_v59, %v2470_v60  ;;  %v2482_v3 = vld [vmem:[#allocation5 + $0x350] sm:$0xff] }
 0x450   :  { %v4705_v16 = vcombine.high %v2505_v11, %v2517_v12  ;;  %v2494_v4 = vld [vmem:[#allocation5 + $0x3b0] sm:$0xff] }
 0x452   :  { %3911 = vmatpush1.bf16.msra.mxu1 %v4698_v19  ;;  %3952 = vmatpush1.bf16.msra.mxu0 %v4700_v20  ;;  %v2529_v19 = vld [vmem:[#allocation5 + $0x4c8] sm:$0xff] }
 0x453   :  { %3912 = vmatprep.subr.bf16.mxu1 %v4723_v21  ;;  %3953 = vmatprep.subr.bf16.mxu0 %v4725_v22  ;;  %v2541_v20 = vld [vmem:[#allocation5 + $0x528] sm:$0xff]  ;;  %v4702_v21 = vcombine.low %v2504_v9, %v2516_v10  ;;  %v4704_v22 = vcombine.low %v2505_v11, %v2517_v12  ;;  %v4683_v9 = vcombine.high %v2482_v3, %v2494_v4  ;;  %v2506_v10 = vld [vmem:[#allocation5 + $0x410] sm:$0xff]  ;;  %v2507_v12 = vld [vmem:[#allocation5 + $0x418] sm:$0xff] }
 0x454   :  { %v4729_v24 = vcombine.high %v2529_v19, %v2541_v20  ;;  %v2518_v11 = vld [vmem:[#allocation5 + $0x470] sm:$0xff] }
 0x456   :  { %3913 = vmatpush1.bf16.msra.mxu1 %v4722_v27  ;;  %3954 = vmatpush1.bf16.msra.mxu0 %v4724_v29  ;;  %v2553_v27 = vld [vmem:[#allocation5 + $0x588] sm:$0xff] }
 0x457   :  { %3914 = vmatprep.subr.bf16.mxu1 %v4747_v30  ;;  %3955 = vmatprep.subr.bf16.mxu0 %v4749_v31  ;;  %v2565_v29 = vld [vmem:[#allocation5 + $0x5e8] sm:$0xff]  ;;  %v4726_v30 = vcombine.low %v2528_v17, %v2540_v18  ;;  %v4728_v31 = vcombine.low %v2529_v19, %v2541_v20  ;;  %v2530_v18 = vld [vmem:[#allocation5 + $0x4d0] sm:$0xff]  ;;  %v2531_v20 = vld [vmem:[#allocation5 + $0x4d8] sm:$0xff] }
 0x458   :  { %v4753_v33 = vcombine.high %v2553_v27, %v2565_v29  ;;  %v2542_v19 = vld [vmem:[#allocation5 + $0x530] sm:$0xff] }
 0x45a   :  { %3915 = vmatpush1.bf16.msra.mxu1 %v4746_v36  ;;  %3956 = vmatpush1.bf16.msra.mxu0 %v4748_v37  ;;  %v2387_v36 = vld [vmem:[#allocation5 + $0x58] sm:$0xff] }
 0x45b   :  { %3982 = vmatprep.subr.bf16.mxu1 %v4583_v38  ;;  %4023 = vmatprep.subr.bf16.mxu0 %v4585_v39  ;;  %v2399_v37 = vld [vmem:[#allocation5 + $0xb8] sm:$0xff]  ;;  %v4750_v38 = vcombine.low %v2552_v25, %v2564_v26  ;;  %v4752_v39 = vcombine.low %v2553_v27, %v2565_v29  ;;  %v2554_v26 = vld [vmem:[#allocation5 + $0x590] sm:$0xff] }
 0x45c   :  { %v4589_v42 = vcombine.high %v2387_v36, %v2399_v37  ;;  %v2566_v27 = vld [vmem:[#allocation5 + $0x5f0] sm:$0xff]  ;;  %v2555_v29 = vld [vmem:[#allocation5 + $0x598] sm:$0xff] }
 0x45d   :  { %3933 = vmatmul.mubr.bf16.vlgmr.msra.gmra.mrb[40].mxu1 %v5759_v40  ;;  %3974 = vmatmul.mubr.bf16.vlgmr.msra.gmra.mrb[40].mxu0 %v5759_v40 }
 0x45e   :  { %3983 = vmatpush1.bf16.msra.mxu1 %v4582_v45  ;;  %4024 = vmatpush1.bf16.msra.mxu0 %v4584_v46  ;;  %v2411_v45 = vld [vmem:[#allocation5 + $0x118] sm:$0xff] }
 0x45f   :  { %3984 = vmatprep.subr.bf16.mxu1 %v4607_v47  ;;  %4025 = vmatprep.subr.bf16.mxu0 %v4609_v48  ;;  %v2423_v46 = vld [vmem:[#allocation5 + $0x178] sm:$0xff]  ;;  %v4586_v47 = vcombine.low %v2386_v34, %v2398_v35  ;;  %v4588_v48 = vcombine.low %v2387_v36, %v2399_v37  ;;  %v4754_v35 = vcombine.low %v2554_v26, %v2566_v27  ;;  %v2574_v37 = vlaneseq }
 0x460   :  { %4014 = vmatprep.mubr.bf16.mxu1 %v5568_v28  ;;  %4055 = vmatprep.mubr.bf16.mxu0 %v5568_v28  ;;  %v4613_v50 = vcombine.high %v2411_v45, %v2423_v46 }
 0x462   :  { %3985 = vmatpush1.bf16.msra.mxu1 %v4606_v53  ;;  %4026 = vmatpush1.bf16.msra.mxu0 %v4608_v54  ;;  %v2435_v53 = vld [vmem:[#allocation5 + $0x1d8] sm:$0xff] }
 0x463   :  { %3986 = vmatprep.subr.bf16.mxu1 %v4631_v55  ;;  %4027 = vmatprep.subr.bf16.mxu0 %v4633_v56  ;;  %v2447_v54 = vld [vmem:[#allocation5 + $0x238] sm:$0xff]  ;;  %v4610_v55 = vcombine.low %v2410_v43, %v2422_v44  ;;  %v4612_v56 = vcombine.low %v2411_v45, %v2423_v46 }
 0x464   :  { %v4637_v58 = vcombine.high %v2435_v53, %v2447_v54 }
 0x466   :  { %3987 = vmatpush1.bf16.msra.mxu1 %v4630_v61  ;;  %4028 = vmatpush1.bf16.msra.mxu0 %v4632_v62  ;;  %v2459_v61 = vld [vmem:[#allocation5 + $0x298] sm:$0xff] }
 0x467   :  { %3988 = vmatprep.subr.bf16.mxu1 %v4655_v63  ;;  %4029 = vmatprep.subr.bf16.mxu0 %v4657_v0  ;;  %v2471_v62 = vld [vmem:[#allocation5 + $0x2f8] sm:$0xff]  ;;  %v4634_v63 = vcombine.low %v2434_v51, %v2446_v52  ;;  %v4636_v0 = vcombine.low %v2435_v53, %v2447_v54 }
 0x468   :  { %v4661_v2 = vcombine.high %v2459_v61, %v2471_v62 }
 0x46a   :  { %3989 = vmatpush1.bf16.msra.mxu1 %v4654_v5  ;;  %4030 = vmatpush1.bf16.msra.mxu0 %v4656_v6  ;;  %v2483_v5 = vld [vmem:[#allocation5 + $0x358] sm:$0xff] }
 0x46b   :  { %3990 = vmatprep.subr.bf16.mxu1 %v4679_v7  ;;  %4031 = vmatprep.subr.bf16.mxu0 %v4681_v8  ;;  %v2495_v6 = vld [vmem:[#allocation5 + $0x3b8] sm:$0xff]  ;;  %v4658_v7 = vcombine.low %v2458_v59, %v2470_v60  ;;  %v4660_v8 = vcombine.low %v2459_v61, %v2471_v62 }
 0x46e   :  { %3991 = vmatpush1.bf16.msra.mxu1 %v4678_v13  ;;  %4032 = vmatpush1.bf16.msra.mxu0 %v4680_v14  ;;  %v2519_v13 = vld [vmem:[#allocation5 + $0x478] sm:$0xff]  ;;  %v4682_v14 = vcombine.low %v2482_v3, %v2494_v4 }
 0x46f   :  { %3992 = vmatprep.subr.bf16.mxu1 %v4703_v15  ;;  %4033 = vmatprep.subr.bf16.mxu0 %v4705_v16  ;;  %v4684_v15 = vcombine.low %v2483_v5, %v2495_v6  ;;  %v4707_v16 = vcombine.high %v2506_v10, %v2518_v11  ;;  %v4709_v17 = vcombine.high %v2507_v12, %v2519_v13 }
 0x472   :  { %3993 = vmatpush1.bf16.msra.mxu1 %v4702_v21  ;;  %4034 = vmatpush1.bf16.msra.mxu0 %v4704_v22  ;;  %v2543_v21 = vld [vmem:[#allocation5 + $0x538] sm:$0xff]  ;;  %v4706_v22 = vcombine.low %v2506_v10, %v2518_v11 }
 0x473   :  { %3994 = vmatprep.subr.bf16.mxu1 %v4727_v23  ;;  %4035 = vmatprep.subr.bf16.mxu0 %v4729_v24  ;;  %v4708_v23 = vcombine.low %v2507_v12, %v2519_v13  ;;  %v4731_v24 = vcombine.high %v2530_v18, %v2542_v19  ;;  %v4733_v25 = vcombine.high %v2531_v20, %v2543_v21 }
 0x476   :  { %3995 = vmatpush1.bf16.msra.mxu1 %v4726_v30  ;;  %4036 = vmatpush1.bf16.msra.mxu0 %v4728_v31  ;;  %v2567_v30 = vld [vmem:[#allocation5 + $0x5f8] sm:$0xff]  ;;  %v4730_v31 = vcombine.low %v2530_v18, %v2542_v19 }
 0x477   :  { %3996 = vmatprep.subr.bf16.mxu1 %v4751_v32  ;;  %4037 = vmatprep.subr.bf16.mxu0 %v4753_v33  ;;  %v4732_v32 = vcombine.low %v2531_v20, %v2543_v21  ;;  %v4755_v33 = vcombine.high %v2554_v26, %v2566_v27  ;;  %v4757_v34 = vcombine.high %v2555_v29, %v2567_v30 }
 0x478   :  { %v4756_v36 = vcombine.low %v2555_v29, %v2567_v30 }
 0x47a   :  { %3997 = vmatpush1.bf16.msra.mxu1 %v4750_v38  ;;  %4038 = vmatpush1.bf16.msra.mxu0 %v4752_v39  ;;  %v2575_v38 = vshrl.u32 %v2574_v37, 7 }
 0x47b   :  { %4064 = vmatprep.subr.bf16.mxu1 %v4587_v41  ;;  %4105 = vmatprep.subr.bf16.mxu0 %v4589_v42  ;;  %v5790_v42 = vld [vmem:[%s5895_s9] sm:$0xff] }
 0x47c   :  { %v5783_v39 = vsub.s32 0, %v2575_v38  ;;  %v5785_v41 = vsub.s32 2, %v2575_v38  ;;  %v5792_v43 = vsub.s32 1, %v2575_v38  ;;  %v5794_v44 = vsub.s32 3, %v2575_v38 }
 0x47d   :  { %4015 = vmatmul.mubr.bf16.vlgmr.msra.gmra.mrb[44].mxu1 %v5759_v40  ;;  %4056 = vmatmul.mubr.bf16.vlgmr.msra.gmra.mrb[44].mxu0 %v5759_v40  ;;  %v5810_v10 = vsub.s32 7, %v2575_v38 }
 0x47e   :  { %4065 = vmatpush1.bf16.msra.mxu1 %v4586_v47  ;;  %4106 = vmatpush1.bf16.msra.mxu0 %v4588_v48  ;;  %v2577_v45 = vrot.slane %v5790_v42, %v5783_v39  ;;  %v2581_v46 = vrot.slane %v5790_v42, %v5792_v43  ;;  %v2589_v47 = vrot.slane %v5790_v42, %v5794_v44 }
 0x47f   :  { %4066 = vmatprep.subr.bf16.mxu1 %v4611_v49  ;;  %4107 = vmatprep.subr.bf16.mxu0 %v4613_v50 }
 0x480   :  { %4096 = vmatprep.mubr.bf16.mxu1 %v5568_v28  ;;  %4137 = vmatprep.mubr.bf16.mxu0 %v5568_v28  ;;  %v4685_v28 = vcombine.high %v2483_v5, %v2495_v6 }
 0x482   :  { %4067 = vmatpush1.bf16.msra.mxu1 %v4610_v55  ;;  %4108 = vmatpush1.bf16.msra.mxu0 %v4612_v56 }
 0x483   :  { %4068 = vmatprep.subr.bf16.mxu1 %v4635_v57  ;;  %4109 = vmatprep.subr.bf16.mxu0 %v4637_v58 }
 0x486   :  { %4069 = vmatpush1.bf16.msra.mxu1 %v4634_v63  ;;  %4110 = vmatpush1.bf16.msra.mxu0 %v4636_v0 }
 0x487   :  { %4070 = vmatprep.subr.bf16.mxu1 %v4659_v1  ;;  %4111 = vmatprep.subr.bf16.mxu0 %v4661_v2 }
 0x48a   :  { %4071 = vmatpush1.bf16.msra.mxu1 %v4658_v7  ;;  %4112 = vmatpush1.bf16.msra.mxu0 %v4660_v8  ;;  %v5804_v8 = vsub.s32 4, %v2575_v38 }
 0x48b   :  { %4072 = vmatprep.subr.bf16.mxu1 %v4683_v9  ;;  %4113 = vmatprep.subr.bf16.mxu0 %v4685_v28  ;;  %v5806_v9 = vsub.s32 6, %v2575_v38  ;;  %v5808_v28 = vsub.s32 5, %v2575_v38 }
 0x48c   :  { %v2593_v13 = vrot.slane %v5790_v42, %v5804_v8 }
 0x48e   :  { %4073 = vmatpush1.bf16.msra.mxu1 %v4682_v14  ;;  %4114 = vmatpush1.bf16.msra.mxu0 %v4684_v15  ;;  %v2601_v14 = vrot.slane %v5790_v42, %v5806_v9 }
 0x48f   :  { %4074 = vmatprep.subr.bf16.mxu1 %v4707_v16  ;;  %4115 = vmatprep.subr.bf16.mxu0 %v4709_v17  ;;  %v2597_v16 = vrot.slane %v5790_v42, %v5808_v28  ;;  %v2605_v17 = vrot.slane %v5790_v42, %v5810_v10 }
 0x492   :  { %4075 = vmatpush1.bf16.msra.mxu1 %v4706_v22  ;;  %4116 = vmatpush1.bf16.msra.mxu0 %v4708_v23 }
 0x493   :  { %4076 = vmatprep.subr.bf16.mxu1 %v4731_v24  ;;  %4117 = vmatprep.subr.bf16.mxu0 %v4733_v25 }
 0x496   :  { %4077 = vmatpush1.bf16.msra.mxu1 %v4730_v31  ;;  %4118 = vmatpush1.bf16.msra.mxu0 %v4732_v32 }
 0x497   :  { %4078 = vmatprep.subr.bf16.mxu1 %v4755_v33  ;;  %4119 = vmatprep.subr.bf16.mxu0 %v4757_v34 }
 0x49a   :  { %4079 = vmatpush1.bf16.msra.mxu1 %v4754_v35  ;;  %4120 = vmatpush1.bf16.msra.mxu0 %v4756_v36 }
 0x49d   :  { %4097 = vmatmul.mubr.bf16.vlgmr.msra.gmra.mrb[48].mxu1 %v5759_v40  ;;  %4138 = vmatmul.mubr.bf16.vlgmr.msra.gmra.mrb[48].mxu0 %v5759_v40  ;;  %v2585_v40 = vrot.slane %v5790_v42, %v5785_v41 }
 0x4d0   :  { %v3688_v48 = vpop.f32.mrb[28].mxu1  ;;  %v3729_v49 = vpop.f32.mrb[28].mxu0 }
 0x4d1   :  { %v3689_v50 = vadd.f32 %v3688_v48, %v2577_v45  ;;  %v3730_v51 = vadd.f32 %v3729_v49, %v2585_v40  ;;  %v3690_v52 = vpop.f32.mrb[29].mxu1  ;;  %v3731_v53 = vpop.f32.mrb[29].mxu0  ;;  %v5823_v48 = vld [vmem:[%s5895_s9 + $0x8] sm:$0xff] }
 0x4d2   :  { %v3691_v54 = vadd.f32 %v3690_v52, %v2581_v46  ;;  %v3732_v55 = vadd.f32 %v3731_v53, %v2589_v47  ;;  %v3692_v56 = vpop.f32.mrb[30].mxu1  ;;  %v3733_v57 = vpop.f32.mrb[30].mxu0  ;;  %v2617_v52 = vrot.slane %v5823_v48, %v5785_v41 }
 0x4d3   :  { %v4758_v58 = vmul.f32 -1.442695, %v3689_v50  ;;  %v4760_v59 = vmul.f32 -1.442695, %v3730_v51  ;;  %v3693_v60 = vpop.f32.mrb[31].mxu1  ;;  %v3734_v61 = vpop.f32.mrb[31].mxu0  ;;  %v2609_v51 = vrot.slane %v5823_v48, %v5783_v39 }
 0x4d4   :  { %v4759_v62 = vmul.f32 -1.442695, %v3691_v54  ;;  %v4761_v63 = vmul.f32 -1.442695, %v3732_v55  ;;  %v2613_v54 = vrot.slane %v5823_v48, %v5792_v43  ;;  %v2621_v55 = vrot.slane %v5823_v48, %v5794_v44 }
 0x4d5   :  { %5366 = vpow2.f32 %v4758_v58 }
 0x4d6   :  { %5368 = vpow2.f32 %v4760_v59 }
 0x4d7   :  { %5370 = vpow2.f32 %v4759_v62 }
 0x4d8   :  { %5372 = vpow2.f32 %v4761_v63 }
 0x4df   :  { %v5367_v0 = vpop.eup %5366 }
 0x4e0   :  { %v5369_v1 = vpop.eup %5368  ;;  %v4218_v2 = vadd.f32 1.0, %v5367_v0 }
 0x4e1   :  { %v5371_v3 = vpop.eup %5370  ;;  %v4220_v4 = vadd.f32 1.0, %v5369_v1 }
 0x4e2   :  { %v5373_v5 = vpop.eup %5372  ;;  %5374 = vrcp.f32 %v4218_v2  ;;  %v4219_v6 = vadd.f32 1.0, %v5371_v3 }
 0x4e3   :  { %5376 = vrcp.f32 %v4220_v4  ;;  %v4221_v7 = vadd.f32 1.0, %v5373_v5 }
 0x4e4   :  { %5378 = vrcp.f32 %v4219_v6 }
 0x4e5   :  { %5380 = vrcp.f32 %v4221_v7 }
 0x4ec   :  { %v5375_v11 = vpop.eup %5374 }
 0x4ed   :  { %v5377_v12 = vpop.eup %5376  ;;  %4290 = vst [vmem:[#allocation7] sm:$0xff] %v5375_v11 }
 0x4ee   :  { %v5379_v15 = vpop.eup %5378  ;;  %4292 = vst [vmem:[#allocation7 + $0x10] sm:$0xff] %v5377_v12 }
 0x4ef   :  { %v5381_v18 = vpop.eup %5380  ;;  %4291 = vst [vmem:[#allocation7 + $0x8] sm:$0xff] %v5379_v15 }
 0x4f0   :  { %4293 = vst [vmem:[#allocation7 + $0x18] sm:$0xff] %v5381_v18  ;;  %v3770_v19 = vpop.f32.mrb[32].mxu1  ;;  %v3811_v20 = vpop.f32.mrb[32].mxu0 }
 0x4f1   :  { %v3771_v21 = vadd.f32 %v3770_v19, %v2593_v13  ;;  %v3812_v22 = vadd.f32 %v3811_v20, %v2601_v14  ;;  %v3772_v23 = vpop.f32.mrb[33].mxu1  ;;  %v3813_v24 = vpop.f32.mrb[33].mxu0 }
 0x4f2   :  { %v3773_v25 = vadd.f32 %v3772_v23, %v2597_v16  ;;  %v3814_v26 = vadd.f32 %v3813_v24, %v2605_v17  ;;  %v3774_v27 = vpop.f32.mrb[34].mxu1  ;;  %v3815_v29 = vpop.f32.mrb[34].mxu0 }
 0x4f3   :  { %v4762_v30 = vmul.f32 -1.442695, %v3771_v21  ;;  %v4764_v31 = vmul.f32 -1.442695, %v3812_v22  ;;  %v3775_v32 = vpop.f32.mrb[35].mxu1  ;;  %v3816_v33 = vpop.f32.mrb[35].mxu0 }
 0x4f4   :  { %v4763_v34 = vmul.f32 -1.442695, %v3773_v25  ;;  %v4765_v35 = vmul.f32 -1.442695, %v3814_v26 }
 0x4f5   :  { %5382 = vpow2.f32 %v4762_v30 }
 0x4f6   :  { %5384 = vpow2.f32 %v4764_v31 }
 0x4f7   :  { %5386 = vpow2.f32 %v4763_v34 }
 0x4f8   :  { %5388 = vpow2.f32 %v4765_v35 }
 0x4ff   :  { %v5383_v36 = vpop.eup %5382 }
 0x500   :  { %v5385_v37 = vpop.eup %5384  ;;  %v4222_v38 = vadd.f32 1.0, %v5383_v36 }
 0x501   :  { %v5387_v42 = vpop.eup %5386  ;;  %v4224_v45 = vadd.f32 1.0, %v5385_v37 }
 0x502   :  { %v5389_v40 = vpop.eup %5388  ;;  %5390 = vrcp.f32 %v4222_v38  ;;  %v4223_v46 = vadd.f32 1.0, %v5387_v42 }
 0x503   :  { %5392 = vrcp.f32 %v4224_v45  ;;  %v4225_v47 = vadd.f32 1.0, %v5389_v40 }
 0x504   :  { %5394 = vrcp.f32 %v4223_v46 }
 0x505   :  { %5396 = vrcp.f32 %v4225_v47 }
 0x50c   :  { %v5391_v49 = vpop.eup %5390 }
 0x50d   :  { %v5393_v50 = vpop.eup %5392  ;;  %4294 = vst [vmem:[#allocation7 + $0x20] sm:$0xff] %v5391_v49 }
 0x50e   :  { %v5395_v53 = vpop.eup %5394  ;;  %4296 = vst [vmem:[#allocation7 + $0x30] sm:$0xff] %v5393_v50 }
 0x50f   :  { %v5397_v56 = vpop.eup %5396  ;;  %4295 = vst [vmem:[#allocation7 + $0x28] sm:$0xff] %v5395_v53 }
 0x510   :  { %4297 = vst [vmem:[#allocation7 + $0x38] sm:$0xff] %v5397_v56  ;;  %v3852_v57 = vpop.f32.mrb[36].mxu1  ;;  %v3893_v58 = vpop.f32.mrb[36].mxu0 }
 0x511   :  { %v3853_v59 = vadd.f32 %v3852_v57, %v2609_v51  ;;  %v3894_v60 = vadd.f32 %v3893_v58, %v2617_v52  ;;  %v3854_v61 = vpop.f32.mrb[37].mxu1  ;;  %v3895_v62 = vpop.f32.mrb[37].mxu0 }
 0x512   :  { %5517 = shalt.err (!%p5514_p6)
}
 0x513   :  { %s5518_s29 = scalar_lea.hbm %s5897_s11, 128 }
 0x514   :  { %p5519_p7 = scmp.ne.s32.totalorder %s5897_s11, %s5518_s29  ;;  %p5522_p8 = scmp.lt.u32.totalorder %s5518_s29, %s5897_s11 }
 0x516   :  { %p5524_p9 = pnand %p5522_p8, %p5519_p7 }
 0x518   :  { %5527 = shalt.err (!%p5524_p9)
}
 0x519   :  { %4335 = dma.vmem_to_hbm [thread:$0]  %s4333_s26, 128, %s5897_s11, [#allocation9]   ;;  %v3855_v63 = vadd.f32 %v3854_v61, %v2613_v54  ;;  %v3896_v0 = vadd.f32 %v3895_v62, %v2621_v55  ;;  %v3856_v1 = vpop.f32.mrb[38].mxu1  ;;  %v3897_v2 = vpop.f32.mrb[38].mxu0  ;;  %v4766_v3 = vmul.f32 -1.442695, %v3853_v59  ;;  %v2625_v22 = vrot.slane %v5823_v48, %v5804_v8 }
 0x51a   :  { %v4768_v4 = vmul.f32 -1.442695, %v3894_v60  ;;  %v3857_v5 = vpop.f32.mrb[39].mxu1  ;;  %v3898_v6 = vpop.f32.mrb[39].mxu0  ;;  %v2633_v23 = vrot.slane %v5823_v48, %v5806_v9  ;;  %v2629_v25 = vrot.slane %v5823_v48, %v5808_v28  ;;  %v2637_v26 = vrot.slane %v5823_v48, %v5810_v10  ;;  %v5856_v57 = vld [vmem:[%s5895_s9 + $0x10] sm:$0xff]  ;;  %s5570_s9 = smov [#allocation7]  }
 0x51b   :  { %v4767_v7 = vmul.f32 -1.442695, %v3855_v63  ;;  %v4769_v11 = vmul.f32 -1.442695, %v3896_v0  ;;  %5398 = vpow2.f32 %v4766_v3  ;;  %v2641_v60 = vrot.slane %v5856_v57, %v5783_v39  ;;  %s4322_s4 = sshll.u32 %s5570_s9, 4  ;;  %s4323_s4 = int_to_ptr.vmem [resolvable:$true] %s4322_s4 }
 0x51c   :  { %5400 = vpow2.f32 %v4768_v4  ;;  %v2649_v61 = vrot.slane %v5856_v57, %v5785_v41  ;;  %v2645_v63 = vrot.slane %v5856_v57, %v5792_v43  ;;  %v2653_v0 = vrot.slane %v5856_v57, %v5794_v44  ;;  %s5528_s17 = scalar_lea.vmem %s4323_s4, 3072  ;;  %p5533_p11 = scmp.lt.s32.totalorder %s4323_s4, %s4323_s4 }
 0x51d   :  { %5402 = vpow2.f32 %v4767_v7  ;;  %p5529_p10 = scmp.ne.s32.totalorder %s4323_s4, %s5528_s17  ;;  %p5534_p12 = scmp.lt.s32.totalorder %s5528_s17, %s5528_s17 }
 0x51e   :  { %5404 = vpow2.f32 %v4769_v11 }
 0x51f   :  { %p5535_p13 = por %p5534_p12, %p5533_p11 }
 0x521   :  { %p5536_p0 = pnand %p5535_p13, %p5529_p10 }
 0x525   :  { %v5399_v12 = vpop.eup %5398 }
 0x526   :  { %v5401_v13 = vpop.eup %5400  ;;  %v4226_v14 = vadd.f32 1.0, %v5399_v12 }
 0x527   :  { %v5403_v15 = vpop.eup %5402  ;;  %v4228_v16 = vadd.f32 1.0, %v5401_v13 }
 0x528   :  { %v5405_v17 = vpop.eup %5404  ;;  %5406 = vrcp.f32 %v4226_v14  ;;  %v4227_v18 = vadd.f32 1.0, %v5403_v15 }
 0x529   :  { %5408 = vrcp.f32 %v4228_v16  ;;  %v4229_v19 = vadd.f32 1.0, %v5405_v17 }
 0x52a   :  { %5410 = vrcp.f32 %v4227_v18 }
 0x52b   :  { %5412 = vrcp.f32 %v4229_v19 }
 0x530   :  { %v3934_v29 = vpop.f32.mrb[40].mxu1  ;;  %v3975_v30 = vpop.f32.mrb[40].mxu0 }
 0x531   :  { %v3935_v31 = vadd.f32 %v3934_v29, %v2625_v22  ;;  %v3976_v32 = vadd.f32 %v3975_v30, %v2633_v23  ;;  %v3936_v33 = vpop.f32.mrb[41].mxu1  ;;  %v3977_v34 = vpop.f32.mrb[41].mxu0  ;;  %v2665_v29 = vrot.slane %v5856_v57, %v5806_v9 }
 0x532   :  { %v5407_v20 = vpop.eup %5406  ;;  %v3937_v35 = vadd.f32 %v3936_v33, %v2629_v25  ;;  %v3978_v36 = vadd.f32 %v3977_v34, %v2637_v26  ;;  %v3938_v37 = vpop.f32.mrb[42].mxu1 }
 0x533   :  { %v5409_v21 = vpop.eup %5408  ;;  %4298 = vst [vmem:[#allocation7 + $0x40] sm:$0xff] %v5407_v20  ;;  %v3979_v38 = vpop.f32.mrb[42].mxu0  ;;  %v4770_v42 = vmul.f32 -1.442695, %v3935_v31  ;;  %v4772_v45 = vmul.f32 -1.442695, %v3976_v32  ;;  %v2661_v31 = vrot.slane %v5856_v57, %v5808_v28  ;;  %v2669_v32 = vrot.slane %v5856_v57, %v5810_v10 }
 0x534   :  { %v5411_v24 = vpop.eup %5410  ;;  %4300 = vst [vmem:[#allocation7 + $0x50] sm:$0xff] %v5409_v21  ;;  %v3939_v40 = vpop.f32.mrb[43].mxu1  ;;  %v4771_v47 = vmul.f32 -1.442695, %v3937_v35  ;;  %v4773_v49 = vmul.f32 -1.442695, %v3978_v36 }
 0x535   :  { %v5413_v27 = vpop.eup %5412  ;;  %4299 = vst [vmem:[#allocation7 + $0x48] sm:$0xff] %v5411_v24  ;;  %v3980_v46 = vpop.f32.mrb[43].mxu0  ;;  %5414 = vpow2.f32 %v4770_v42 }
 0x536   :  { %4301 = vst [vmem:[#allocation7 + $0x58] sm:$0xff] %v5413_v27  ;;  %5416 = vpow2.f32 %v4772_v45  ;;  %v2657_v27 = vrot.slane %v5856_v57, %v5804_v8 }
 0x537   :  { %5418 = vpow2.f32 %v4771_v47 }
 0x538   :  { %5420 = vpow2.f32 %v4773_v49 }
 0x53f   :  { %v5415_v48 = vpop.eup %5414 }
 0x540   :  { %v5417_v50 = vpop.eup %5416  ;;  %v4230_v51 = vadd.f32 1.0, %v5415_v48 }
 0x541   :  { %v5419_v52 = vpop.eup %5418  ;;  %v4232_v53 = vadd.f32 1.0, %v5417_v50 }
 0x542   :  { %v5421_v54 = vpop.eup %5420  ;;  %5422 = vrcp.f32 %v4230_v51  ;;  %v4231_v55 = vadd.f32 1.0, %v5419_v52 }
 0x543   :  { %5424 = vrcp.f32 %v4232_v53  ;;  %v4233_v56 = vadd.f32 1.0, %v5421_v54 }
 0x544   :  { %5426 = vrcp.f32 %v4231_v55 }
 0x545   :  { %5428 = vrcp.f32 %v4233_v56 }
 0x54c   :  { %v5423_v58 = vpop.eup %5422 }
 0x54d   :  { %v5425_v59 = vpop.eup %5424  ;;  %4302 = vst [vmem:[#allocation7 + $0x60] sm:$0xff] %v5423_v58 }
 0x54e   :  { %v5427_v62 = vpop.eup %5426  ;;  %4304 = vst [vmem:[#allocation7 + $0x70] sm:$0xff] %v5425_v59 }
 0x54f   :  { %v5429_v1 = vpop.eup %5428  ;;  %4303 = vst [vmem:[#allocation7 + $0x68] sm:$0xff] %v5427_v62 }
 0x550   :  { %4305 = vst [vmem:[#allocation7 + $0x78] sm:$0xff] %v5429_v1  ;;  %v4016_v2 = vpop.f32.mrb[44].mxu1  ;;  %v4057_v3 = vpop.f32.mrb[44].mxu0 }
 0x551   :  { %v4017_v4 = vadd.f32 %v4016_v2, %v2641_v60  ;;  %v4058_v5 = vadd.f32 %v4057_v3, %v2649_v61  ;;  %v4018_v6 = vpop.f32.mrb[45].mxu1  ;;  %v4059_v39 = vpop.f32.mrb[45].mxu0 }
 0x552   :  { %v4019_v7 = vadd.f32 %v4018_v6, %v2645_v63  ;;  %v4060_v11 = vadd.f32 %v4059_v39, %v2653_v0  ;;  %v4020_v41 = vpop.f32.mrb[46].mxu1  ;;  %v4061_v12 = vpop.f32.mrb[46].mxu0 }
 0x553   :  { %v4774_v13 = vmul.f32 -1.442695, %v4017_v4  ;;  %v4776_v14 = vmul.f32 -1.442695, %v4058_v5  ;;  %v4021_v15 = vpop.f32.mrb[47].mxu1  ;;  %v4062_v43 = vpop.f32.mrb[47].mxu0 }
 0x554   :  { %v4775_v16 = vmul.f32 -1.442695, %v4019_v7  ;;  %v4777_v17 = vmul.f32 -1.442695, %v4060_v11 }
 0x555   :  { %5430 = vpow2.f32 %v4774_v13 }
 0x556   :  { %5432 = vpow2.f32 %v4776_v14 }
 0x557   :  { %5434 = vpow2.f32 %v4775_v16 }
 0x558   :  { %5436 = vpow2.f32 %v4777_v17 }
 0x55f   :  { %v5431_v44 = vpop.eup %5430 }
 0x560   :  { %v5433_v18 = vpop.eup %5432  ;;  %v4234_v19 = vadd.f32 1.0, %v5431_v44 }
 0x561   :  { %v5435_v20 = vpop.eup %5434  ;;  %v4236_v21 = vadd.f32 1.0, %v5433_v18 }
 0x562   :  { %v5437_v22 = vpop.eup %5436  ;;  %5438 = vrcp.f32 %v4234_v19  ;;  %v4235_v23 = vadd.f32 1.0, %v5435_v20 }
 0x563   :  { %5440 = vrcp.f32 %v4236_v21  ;;  %v4237_v24 = vadd.f32 1.0, %v5437_v22 }
 0x564   :  { %5442 = vrcp.f32 %v4235_v23 }
 0x565   :  { %5444 = vrcp.f32 %v4237_v24 }
 0x56c   :  { %v5439_v25 = vpop.eup %5438 }
 0x56d   :  { %v5441_v26 = vpop.eup %5440  ;;  %4306 = vst [vmem:[#allocation7 + $0x80] sm:$0xff] %v5439_v25 }
 0x56e   :  { %v5443_v30 = vpop.eup %5442  ;;  %4308 = vst [vmem:[#allocation7 + $0x90] sm:$0xff] %v5441_v26 }
 0x56f   :  { %v5445_v33 = vpop.eup %5444  ;;  %4307 = vst [vmem:[#allocation7 + $0x88] sm:$0xff] %v5443_v30 }
 0x570   :  { %4309 = vst [vmem:[#allocation7 + $0x98] sm:$0xff] %v5445_v33  ;;  %v4098_v34 = vpop.f32.mrb[48].mxu1  ;;  %v4139_v35 = vpop.f32.mrb[48].mxu0 }
 0x571   :  { %v4099_v36 = vadd.f32 %v4098_v34, %v2657_v27  ;;  %v4140_v37 = vadd.f32 %v4139_v35, %v2665_v29  ;;  %v4100_v38 = vpop.f32.mrb[49].mxu1  ;;  %v4141_v8 = vpop.f32.mrb[49].mxu0 }
 0x572   :  { %v4101_v42 = vadd.f32 %v4100_v38, %v2661_v31  ;;  %v4142_v45 = vadd.f32 %v4141_v8, %v2669_v32  ;;  %v4102_v9 = vpop.f32.mrb[50].mxu1  ;;  %v4143_v40 = vpop.f32.mrb[50].mxu0 }
 0x573   :  { %v4778_v46 = vmul.f32 -1.442695, %v4099_v36  ;;  %v4780_v47 = vmul.f32 -1.442695, %v4140_v37  ;;  %v4103_v49 = vpop.f32.mrb[51].mxu1  ;;  %v4144_v28 = vpop.f32.mrb[51].mxu0 }
 0x574   :  { %v4779_v48 = vmul.f32 -1.442695, %v4101_v42  ;;  %v4781_v50 = vmul.f32 -1.442695, %v4142_v45 }
 0x575   :  { %5446 = vpow2.f32 %v4778_v46 }
 0x576   :  { %5448 = vpow2.f32 %v4780_v47 }
 0x577   :  { %5450 = vpow2.f32 %v4779_v48 }
 0x578   :  { %5452 = vpow2.f32 %v4781_v50 }
 0x57f   :  { %v5447_v10 = vpop.eup %5446 }
 0x580   :  { %v5449_v51 = vpop.eup %5448  ;;  %v4238_v52 = vadd.f32 1.0, %v5447_v10 }
 0x581   :  { %v5451_v53 = vpop.eup %5450  ;;  %v4240_v54 = vadd.f32 1.0, %v5449_v51 }
 0x582   :  { %v5453_v55 = vpop.eup %5452  ;;  %5454 = vrcp.f32 %v4238_v52  ;;  %v4239_v56 = vadd.f32 1.0, %v5451_v53 }
 0x583   :  { %5456 = vrcp.f32 %v4240_v54  ;;  %v4241_v57 = vadd.f32 1.0, %v5453_v55 }
 0x584   :  { %5458 = vrcp.f32 %v4239_v56 }
 0x585   :  { %5460 = vrcp.f32 %v4241_v57 }
 0x58c   :  { %v5455_v58 = vpop.eup %5454 }
 0x58d   :  { %v5457_v59 = vpop.eup %5456  ;;  %4310 = vst [vmem:[#allocation7 + $0xa0] sm:$0xff] %v5455_v58 }
 0x58e   :  { %v5459_v60 = vpop.eup %5458  ;;  %4312 = vst [vmem:[#allocation7 + $0xb0] sm:$0xff] %v5457_v59 }
 0x58f   :  { %v5461_v61 = vpop.eup %5460  ;;  %4311 = vst [vmem:[#allocation7 + $0xa8] sm:$0xff] %v5459_v60 }
 0x590   :  { %4313 = vst [vmem:[#allocation7 + $0xb8] sm:$0xff] %v5461_v61 }
 0x591   :  { %5539 = shalt.err (!%p5536_p0)
}
 0x592   :  { %s5540_s21 = scalar_lea.hbm %s5896_s10, 3072 }
 0x593   :  { %p5541_p1 = scmp.ne.s32.totalorder %s5896_s10, %s5540_s21  ;;  %p5544_p2 = scmp.lt.u32.totalorder %s5540_s21, %s5896_s10 }
 0x595   :  { %p5546_p3 = pnand %p5544_p2, %p5541_p1 }
 0x597   :  { %5549 = shalt.err (!%p5546_p3)
}
 0x598   :  { %4325 = dma.vmem_to_hbm [thread:$0]  %s4323_s4, 3072, %s5896_s10, [#allocation4]  }
 0x599   :  { %5554 = dma.done.wait [#allocation4], 3072  }
 0x59a   :  { %5555 = vsyncadd [#allocation4], 4294964224 }
 0x59b   :  { %5556 = dma.done.wait [#allocation9], 128  }
 0x59c   :  { %5557 = vsyncadd [#allocation9], 4294967168 }
 0x59d   :  { %4342 = vsyncpa [#allocation3], 1 }
 0x59e   :  { %4343 = vsyncpa [#allocation6], 1 }
 0x59f   :  { %4344 = vsyncpa [#allocation4], 1 }
 0x5a0   :  { %4345 = vsyncpa [#allocation9], 1 }

</bundles_post_ra>
